<compile_context>
chip_gen: v7x
topology: tpu7x:2x2x1
jax: 0.10.0
libtpu: 0.0.40
codegen_flags: <defaults>
</compile_context>

<pallas_src>
from functools import partial

import jax
import jax.numpy as jnp
from jax.experimental import pallas as pl
from jax.experimental.pallas import tpu as pltpu


def _topk_routing_kernel(x_ref, w_ref, b_ref, mask_ref, score_ref,
                         logits_ref, *, topk, chunk):
    # x_ref:      (1, C, TM)      channels-first token tile of one batch element
    # w_ref:      (O_pad, C)      router weight (rows >= O zero-padded)
    # b_ref:      (O_pad, 1)      router bias   (rows >= O set to -1e30)
    # mask_ref:   (1, O_pad, TM)  int8 top-k one-hot mask     (tokens on lanes)
    # score_ref:  (1, O_pad, TM)  bf16 softmax routing scores (tokens on lanes)
    # logits_ref: (O_pad, TM)     f32 VMEM scratch
    w = w_ref[...]                       # (O_pad, C)
    bias = b_ref[...]                    # (O_pad, 1), padded rows = -1e30
    o_pad, tm = logits_ref.shape
    n_chunks = tm // chunk               # static

    # 1) One wide MXU matmul for the whole tile: weights pushed once, N = TM
    #    fills the MXU; f32 accumulate into VMEM scratch.
    logits_ref[...] = (
        jnp.dot(w, x_ref[0], preferred_element_type=jnp.float32) + bias)

    # 2) Chunked softmax / top-k over the scratch.  Reductions run over the
    #    sublane (routing-window) axis on the VPU; all stores are lane-dense.
    row_iota = jax.lax.broadcasted_iota(jnp.int32, (o_pad, chunk), 0)  # hoisted
    neg_inf = jnp.float32(-jnp.inf)
    for ci in range(n_chunks):
        sl = slice(ci * chunk, (ci + 1) * chunk)   # static slice -> free view
        logits = logits_ref[:, sl]                 # (O_pad, chunk) f32

        # softmax over the routing axis; EXACT reciprocal so rows sum to 1.
        m = jnp.max(logits, axis=0, keepdims=True)          # (1, chunk)
        e = jnp.exp(logits - m)                              # padded rows -> 0
        denom = jnp.sum(e, axis=0, keepdims=True)
        score = e * pl.reciprocal(denom)                     # EUP, approx=False
        score_ref[0, :, sl] = score.astype(score_ref.dtype)

        # top-k on the raw logits (softmax is monotone -> identical selection).
        # Reuse the softmax max for pass 0; knock each winner out with -inf and
        # build the one-hot mask once at the end from (vals == -inf).
        vals = logits
        mx = m
        for i in range(topk):
            if i > 0:
                mx = jnp.max(vals, axis=0, keepdims=True)
            # first occurrence of the current maximum (deterministic ties)
            idx = jnp.min(jnp.where(vals == mx, row_iota, o_pad),
                          axis=0, keepdims=True)
            vals = jnp.where(row_iota == idx, neg_inf, vals)
        mask_ref[0, :, sl] = (vals == neg_inf).astype(mask_ref.dtype)


def topk_routing_forward(x, w, b, *, n_win, topk, tm=2048, chunk=256,
                         native_layout=False):
    """x: (B, C, H, W) NCHW; w: (O, C, 1, 1); b: (O,), O = n_win*n_win.

    Default returns (mask, routing_score), each (B, H*W, O) float32 — same as
    the PyTorch module's forward().  `native_layout=True` returns the kernel's
    (B, O, H*W) int8 / bf16 tensors without the extra transpose pass.
    """
    B, C, H, W = x.shape
    O = n_win * n_win
    assert w.shape[:2] == (O, C) and b.shape == (O,)
    # padded routing rows carry bias -1e30; they must never be able to win
    assert 0 < topk <= O, "topk must be <= n_win**2"
    HW = H * W

    # Sub-32-bit outputs pack along sublanes (int8 -> 32, bf16 -> 16): pad the
    # routing axis to a multiple of 32 so both outputs keep native tilings.
    O_pad = pl.cdiv(O, 32) * 32

    # ---- token tile (lanes): multiple of 128, clipped to the data size ----
    tm = max(128, min((tm // 128) * 128, pl.cdiv(HW, 128) * 128))
    # v7x has 2 TensorCores: keep the fully-parallel grid at >= 4 steps when
    # possible so work shards evenly instead of idling a core.
    while B * pl.cdiv(HW, tm) < 4 and tm > 512:
        tm = max(512, ((tm // 2) // 128) * 128)
    chunk = min(chunk, tm)
    while tm % chunk:
        chunk -= 128

    n_tiles = pl.cdiv(HW, tm)
    HW_out = n_tiles * tm          # outputs padded to full tiles; sliced below

    # channels-first token matrix: pure reshape, no transpose and no pad pass
    # over HBM.  A ragged last tile overhangs HW: Pallas masks the boundary
    # block (garbage columns in, OOB writes dropped) and we slice it off.
    compute_dtype = x.dtype if x.dtype == jnp.bfloat16 else jnp.float32
    x_flat = x.reshape(B, C, HW).astype(compute_dtype)

    w_p = jnp.pad(w.reshape(O, C), ((0, O_pad - O), (0, 0))).astype(compute_dtype)
    b_p = jnp.pad(b.astype(jnp.float32), (0, O_pad - O),
                  constant_values=-1e30).reshape(O_pad, 1)

    # Deliberate VMEM budget (v7x has only 64 MiB physical / 32 MiB default
    # scoped): double-buffered tiles + the f32 logits scratch, with headroom.
    itemsize = jnp.dtype(compute_dtype).itemsize
    per_step_bytes = (
        2 * C * tm * itemsize                      # x tile (double buffered)
        + 2 * (O_pad * C * itemsize + O_pad * 4)   # weight + bias
        + 2 * O_pad * tm * (1 + 2)                 # int8 mask + bf16 score tiles
        + O_pad * tm * 4)                          # f32 logits scratch
    vmem_limit = int(min(64 << 20, max(32 << 20, 2 * per_step_bytes)))

    mask_t, score_t = pl.pallas_call(
        partial(_topk_routing_kernel, topk=topk, chunk=chunk),
        out_shape=(
            jax.ShapeDtypeStruct((B, O_pad, HW_out), jnp.int8),      # mask
            jax.ShapeDtypeStruct((B, O_pad, HW_out), jnp.bfloat16),  # score
        ),
        grid_spec=pltpu.PrefetchScalarGridSpec(
            num_scalar_prefetch=0,
            grid=(B, n_tiles),
            in_specs=[
                pl.BlockSpec((1, C, tm), lambda bi, ti: (bi, 0, ti)),   # tokens
                pl.BlockSpec((O_pad, C), lambda bi, ti: (0, 0)),        # weight
                pl.BlockSpec((O_pad, 1), lambda bi, ti: (0, 0)),        # bias
            ],
            out_specs=[
                pl.BlockSpec((1, O_pad, tm), lambda bi, ti: (bi, 0, ti)),
                pl.BlockSpec((1, O_pad, tm), lambda bi, ti: (bi, 0, ti)),
            ],
            scratch_shapes=[pltpu.VMEM((O_pad, tm), jnp.float32)],
        ),
        compiler_params=pltpu.CompilerParams(
            dimension_semantics=("parallel", "parallel"),
            vmem_limit_bytes=vmem_limit),
    )(x_flat, w_p, b_p)

    if native_layout:
        # Fast path for downstream consumers: no transpose pass, small dtypes.
        return mask_t[:, :O, :HW], score_t[:, :O, :HW]

    # PyTorch-parity layout/dtype: one fused slice + f32 upcast + transpose
    # pass (the upcast rides along for free instead of being kernel writeback).
    mask = jnp.transpose(mask_t[:, :O, :HW].astype(jnp.float32), (0, 2, 1))
    score = jnp.transpose(score_t[:, :O, :HW].astype(jnp.float32), (0, 2, 1))
    return mask, score


if __name__ == "__main__":
    B, C, H, W = 2, 4, 16, 16
    n_win, topk = 7, 4
    O = n_win * n_win

    key = jax.random.PRNGKey(0)
    kx, kw, kb = jax.random.split(key, 3)

    x = jax.random.normal(kx, (B, C, H, W), dtype=jnp.float32)
    # Conv2d(dim, n_win*n_win, kernel_size=1) parameter shapes
    w = jax.random.normal(kw, (O, C, 1, 1), dtype=jnp.float32) * 0.1
    b = jax.random.normal(kb, (O,), dtype=jnp.float32) * 0.01
    # TODO(synk): `self.scale` is declared in __init__ but never used in
    # forward(); kept only for parity, not passed to the kernel.
    scale = jnp.ones(())

    mask, score = topk_routing_forward(x, w, b, n_win=n_win, topk=topk)
    jax.block_until_ready((mask, score))

    # ---- lightweight self-check against a pure-JAX reference ----
    ref_logits = jnp.einsum("bchw,oc->bhwo", x, w.reshape(O, C),
                            precision=jax.lax.Precision.HIGHEST) + b
    ref_score = jax.nn.softmax(ref_logits.reshape(B, H * W, O), axis=-1)

    assert mask.shape == (B, H * W, O) and score.shape == (B, H * W, O)
    # bf16 score writeback -> ~0.4% relative rounding; tolerances sized for it
    assert jnp.allclose(score, ref_score, atol=5e-3), "softmax mismatch"
    assert jnp.allclose(jnp.sum(score, axis=-1), 1.0, atol=5e-3), "rows must sum to 1"
    assert jnp.all(jnp.sum(mask, axis=-1) == topk), "mask must have exactly k ones"
    # selected entries must dominate every unselected entry of the same row
    # (checked on the f32 reference scores; tiny slack for MXU rounding ties)
    sel_min = jnp.min(jnp.where(mask > 0, ref_score, jnp.inf), axis=-1)
    unsel_max = jnp.max(jnp.where(mask > 0, -jnp.inf, ref_score), axis=-1)
    assert jnp.all(sel_min >= unsel_max - 1e-4), "top-k selection inconsistent"

    print("KERNEL_OK")
</pallas_src>

<mosaic_0001>
module attributes {stable_mosaic.version = 11 : i64} {
  func.func @_topk_routing_kernel(%arg0: i32, %arg1: i32, %arg2: memref<1x4x256xf32, #tpu.memory_space<vmem>>, %arg3: memref<64x4xf32, #tpu.memory_space<vmem>>, %arg4: memref<64x1xf32, #tpu.memory_space<vmem>>, %arg5: memref<1x64x256xi8, #tpu.memory_space<vmem>>, %arg6: memref<1x64x256xbf16, #tpu.memory_space<vmem>>, %arg7: memref<64x256xf32, #tpu.memory_space<vmem>>) attributes {dimension_semantics = [#tpu.dimension_semantics<parallel>, #tpu.dimension_semantics<parallel>], iteration_bounds = array<i64: 2, 1>, scalar_prefetch = 0 : i64, scratch_operands = 1 : i64, tpu.core_type = #tpu.core_type<tc>, window_params = [{transform_indices = @transform_0, window_bounds = array<i64: 1, 4, 256>}, {pipeline_mode = #tpu.pipeline_mode<synchronous>, transform_indices = @transform_1, window_bounds = array<i64: 64, 4>}, {pipeline_mode = #tpu.pipeline_mode<synchronous>, transform_indices = @transform_2, window_bounds = array<i64: 64, 1>}, {transform_indices = @transform_3, window_bounds = array<i64: 1, 64, 256>}, {transform_indices = @transform_4, window_bounds = array<i64: 1, 64, 256>}]} {
    %c0 = arith.constant 0 : index
    %c0_0 = arith.constant 0 : index
    %0 = vector.load %arg3[%c0, %c0_0] : memref<64x4xf32, #tpu.memory_space<vmem>>, vector<64x4xf32>
    %c0_1 = arith.constant 0 : index
    %c0_2 = arith.constant 0 : index
    %1 = vector.load %arg4[%c0_1, %c0_2] : memref<64x1xf32, #tpu.memory_space<vmem>>, vector<64x1xf32>
    %c0_3 = arith.constant 0 : index
    %c0_4 = arith.constant 0 : index
    %c0_5 = arith.constant 0 : index
    %2 = vector.load %arg2[%c0_3, %c0_4, %c0_5] : memref<1x4x256xf32, #tpu.memory_space<vmem>>, vector<1x4x256xf32>
    %3 = vector.shape_cast %2 : vector<1x4x256xf32> to vector<4x256xf32>
    %cst = arith.constant dense<0.000000e+00> : vector<64x256xf32>
    %4 = tpu.matmul %0, %3, %cst {dimension_numbers = #tpu.dot_dimension_numbers<[1], [0], [0], [1], [0, 0, 1, 1], [], []>} : vector<64x4xf32>, vector<4x256xf32>, vector<64x256xf32> -> vector<64x256xf32>
    %5 = vector.broadcast %1 : vector<64x1xf32> to vector<64x256xf32>
    %6 = arith.addf %4, %5 : vector<64x256xf32>
    %c0_6 = arith.constant 0 : index
    %c0_7 = arith.constant 0 : index
    %7 = vector.load %arg7[%c0_6, %c0_7] : memref<64x256xf32, #tpu.memory_space<vmem>>, vector<64x256xf32>
    tpu.vector_store %arg7[%c0_6, %c0_7], %6 {strides = array<i32>} : memref<64x256xf32, #tpu.memory_space<vmem>>, vector<64x256xf32>,
    %8 = tpu.iota {dimensions = array<i32: 0>} : vector<64x256xi32>
    %c0_8 = arith.constant 0 : index
    %c0_9 = arith.constant 0 : index
    %9 = vector.load %arg7[%c0_8, %c0_9] : memref<64x256xf32, #tpu.memory_space<vmem>>, vector<64x256xf32>
    %cst_10 = arith.constant dense<0xFF800000> : vector<256xf32>
    %10 = vector.multi_reduction <maximumf>, %9, %cst_10 [0] : vector<64x256xf32> to vector<256xf32>
    %11 = vector.shape_cast %10 : vector<256xf32> to vector<1x256xf32>
    %12 = vector.broadcast %11 : vector<1x256xf32> to vector<64x256xf32>
    %13 = arith.subf %9, %12 : vector<64x256xf32>
    %14 = math.exp %13 : vector<64x256xf32>
    %cst_11 = arith.constant dense<0.000000e+00> : vector<256xf32>
    %15 = vector.multi_reduction <add>, %14, %cst_11 [0] : vector<64x256xf32> to vector<256xf32>
    %16 = vector.shape_cast %15 : vector<256xf32> to vector<1x256xf32>
    %17 = tpu.reciprocal %16 : vector<1x256xf32> -> vector<1x256xf32>
    %18 = vector.broadcast %17 : vector<1x256xf32> to vector<64x256xf32>
    %19 = arith.mulf %14, %18 : vector<64x256xf32>
    %20 = arith.truncf %19 : vector<64x256xf32> to vector<64x256xbf16>
    %c0_12 = arith.constant 0 : index
    %c0_13 = arith.constant 0 : index
    %c0_14 = arith.constant 0 : index
    %21 = vector.load %arg6[%c0_12, %c0_13, %c0_14] : memref<1x64x256xbf16, #tpu.memory_space<vmem>>, vector<1x64x256xbf16>
    %22 = vector.shape_cast %21 : vector<1x64x256xbf16> to vector<64x256xbf16>
    %23 = vector.shape_cast %20 : vector<64x256xbf16> to vector<1x64x256xbf16>
    tpu.vector_store %arg6[%c0_12, %c0_13, %c0_14], %23 {strides = array<i32>} : memref<1x64x256xbf16, #tpu.memory_space<vmem>>, vector<1x64x256xbf16>,
    %24 = vector.broadcast %11 : vector<1x256xf32> to vector<64x256xf32>
    %25 = arith.cmpf oeq, %9, %24 : vector<64x256xf32>
    %c64_i32 = arith.constant 64 : i32
    %26 = vector.broadcast %c64_i32 : i32 to vector<64x256xi32>
    %27 = arith.select %25, %8, %26 : vector<64x256xi1>, vector<64x256xi32>
    %cst_15 = arith.constant dense<2147483647> : vector<256xi32>
    %28 = vector.multi_reduction <minsi>, %27, %cst_15 [0] : vector<64x256xi32> to vector<256xi32>
    %29 = vector.shape_cast %28 : vector<256xi32> to vector<1x256xi32>
    %30 = vector.broadcast %29 : vector<1x256xi32> to vector<64x256xi32>
    %31 = arith.cmpi eq, %8, %30 : vector<64x256xi32>
    %cst_16 = arith.constant 0xFF800000 : f32
    %32 = vector.broadcast %cst_16 : f32 to vector<64x256xf32>
    %33 = arith.select %31, %32, %9 : vector<64x256xi1>, vector<64x256xf32>
    %cst_17 = arith.constant dense<0xFF800000> : vector<256xf32>
    %34 = vector.multi_reduction <maximumf>, %33, %cst_17 [0] : vector<64x256xf32> to vector<256xf32>
    %35 = vector.shape_cast %34 : vector<256xf32> to vector<1x256xf32>
    %36 = vector.broadcast %35 : vector<1x256xf32> to vector<64x256xf32>
    %37 = arith.cmpf oeq, %33, %36 : vector<64x256xf32>
    %c64_i32_18 = arith.constant 64 : i32
    %38 = vector.broadcast %c64_i32_18 : i32 to vector<64x256xi32>
    %39 = arith.select %37, %8, %38 : vector<64x256xi1>, vector<64x256xi32>
    %cst_19 = arith.constant dense<2147483647> : vector<256xi32>
    %40 = vector.multi_reduction <minsi>, %39, %cst_19 [0] : vector<64x256xi32> to vector<256xi32>
    %41 = vector.shape_cast %40 : vector<256xi32> to vector<1x256xi32>
    %42 = vector.broadcast %41 : vector<1x256xi32> to vector<64x256xi32>
    %43 = arith.cmpi eq, %8, %42 : vector<64x256xi32>
    %cst_20 = arith.constant 0xFF800000 : f32
    %44 = vector.broadcast %cst_20 : f32 to vector<64x256xf32>
    %45 = arith.select %43, %44, %33 : vector<64x256xi1>, vector<64x256xf32>
    %cst_21 = arith.constant dense<0xFF800000> : vector<256xf32>
    %46 = vector.multi_reduction <maximumf>, %45, %cst_21 [0] : vector<64x256xf32> to vector<256xf32>
    %47 = vector.shape_cast %46 : vector<256xf32> to vector<1x256xf32>
    %48 = vector.broadcast %47 : vector<1x256xf32> to vector<64x256xf32>
    %49 = arith.cmpf oeq, %45, %48 : vector<64x256xf32>
    %c64_i32_22 = arith.constant 64 : i32
    %50 = vector.broadcast %c64_i32_22 : i32 to vector<64x256xi32>
    %51 = arith.select %49, %8, %50 : vector<64x256xi1>, vector<64x256xi32>
    %cst_23 = arith.constant dense<2147483647> : vector<256xi32>
    %52 = vector.multi_reduction <minsi>, %51, %cst_23 [0] : vector<64x256xi32> to vector<256xi32>
    %53 = vector.shape_cast %52 : vector<256xi32> to vector<1x256xi32>
    %54 = vector.broadcast %53 : vector<1x256xi32> to vector<64x256xi32>
    %55 = arith.cmpi eq, %8, %54 : vector<64x256xi32>
    %cst_24 = arith.constant 0xFF800000 : f32
    %56 = vector.broadcast %cst_24 : f32 to vector<64x256xf32>
    %57 = arith.select %55, %56, %45 : vector<64x256xi1>, vector<64x256xf32>
    %cst_25 = arith.constant dense<0xFF800000> : vector<256xf32>
    %58 = vector.multi_reduction <maximumf>, %57, %cst_25 [0] : vector<64x256xf32> to vector<256xf32>
    %59 = vector.shape_cast %58 : vector<256xf32> to vector<1x256xf32>
    %60 = vector.broadcast %59 : vector<1x256xf32> to vector<64x256xf32>
    %61 = arith.cmpf oeq, %57, %60 : vector<64x256xf32>
    %c64_i32_26 = arith.constant 64 : i32
    %62 = vector.broadcast %c64_i32_26 : i32 to vector<64x256xi32>
    %63 = arith.select %61, %8, %62 : vector<64x256xi1>, vector<64x256xi32>
    %cst_27 = arith.constant dense<2147483647> : vector<256xi32>
    %64 = vector.multi_reduction <minsi>, %63, %cst_27 [0] : vector<64x256xi32> to vector<256xi32>
    %65 = vector.shape_cast %64 : vector<256xi32> to vector<1x256xi32>
    %66 = vector.broadcast %65 : vector<1x256xi32> to vector<64x256xi32>
    %67 = arith.cmpi eq, %8, %66 : vector<64x256xi32>
    %cst_28 = arith.constant 0xFF800000 : f32
    %68 = vector.broadcast %cst_28 : f32 to vector<64x256xf32>
    %69 = arith.select %67, %68, %57 : vector<64x256xi1>, vector<64x256xf32>
    %cst_29 = arith.constant 0xFF800000 : f32
    %70 = vector.broadcast %cst_29 : f32 to vector<64x256xf32>
    %71 = arith.cmpf oeq, %69, %70 : vector<64x256xf32>
    %72 = arith.extui %71 : vector<64x256xi1> to vector<64x256xi8>
    %c0_30 = arith.constant 0 : index
    %c0_31 = arith.constant 0 : index
    %c0_32 = arith.constant 0 : index
    %73 = vector.load %arg5[%c0_30, %c0_31, %c0_32] : memref<1x64x256xi8, #tpu.memory_space<vmem>>, vector<1x64x256xi8>
    %74 = vector.shape_cast %73 : vector<1x64x256xi8> to vector<64x256xi8>
    %75 = vector.shape_cast %72 : vector<64x256xi8> to vector<1x64x256xi8>
    tpu.vector_store %arg5[%c0_30, %c0_31, %c0_32], %75 {strides = array<i32>} : memref<1x64x256xi8, #tpu.memory_space<vmem>>, vector<1x64x256xi8>,
    return
  }
  func.func @transform_0(%arg0: i32, %arg1: i32) -> (i32, i32, i32) {
    %c0_i32 = arith.constant 0 : i32
    %c0_i32_0 = arith.constant 0 : i32
    return %arg0, %c0_i32, %arg1 : i32, i32, i32
  }
  func.func @transform_1(%arg0: i32, %arg1: i32) -> (i32, i32) {
    %c0_i32 = arith.constant 0 : i32
    %c0_i32_0 = arith.constant 0 : i32
    %c0_i32_1 = arith.constant 0 : i32
    return %c0_i32, %c0_i32_0 : i32, i32
  }
  func.func @transform_2(%arg0: i32, %arg1: i32) -> (i32, i32) {
    %c0_i32 = arith.constant 0 : i32
    %c0_i32_0 = arith.constant 0 : i32
    %c0_i32_1 = arith.constant 0 : i32
    return %c0_i32, %c0_i32_0 : i32, i32
  }
  func.func @transform_3(%arg0: i32, %arg1: i32) -> (i32, i32, i32) {
    %c0_i32 = arith.constant 0 : i32
    %c0_i32_0 = arith.constant 0 : i32
    return %arg0, %c0_i32, %arg1 : i32, i32, i32
  }
  func.func @transform_4(%arg0: i32, %arg1: i32) -> (i32, i32, i32) {
    %c0_i32 = arith.constant 0 : i32
    %c0_i32_0 = arith.constant 0 : i32
    return %arg0, %c0_i32, %arg1 : i32, i32, i32
  }
}

</mosaic_0001>

<bundles_post_ra>
// kernel: tpu_custom_call.1
= control target key start
LH: loop header
LB: loop body
LE: loop exit
PB: predicated region body
PF: predicated region fallthrough
CT: control target
= control target key end

     0   :  { %10 = vsyncpa [#allocation4], 0  ;;  %s2410_s0 = inlined_call_operand.vmem [shape: f32[2,4,256], index: 0, kind: input, shape index: {}]   ;;  %s2411_s1 = inlined_call_operand.vmem [shape: f32[64,4], index: 1, kind: input, shape index: {}]   ;;  %s2412_s2 = inlined_call_operand.vmem [shape: f32[64,1], index: 2, kind: input, shape index: {}]   ;;  %s2413_s3 = inlined_call_operand.hbm [shape: s8[2,64,256], index: 3, kind: output, shape index: {0}]   ;;  %s2414_s4 = inlined_call_operand.vmem [shape: bf16[2,64,256], index: 4, kind: output, shape index: {1}]  }
   0x1   :  { %12 = vsyncpa [#allocation4 + $0x1], 0  ;;  %s1567_s15 = smov 0   ;;  %s1569_s16 = smov 0  }
   0x2   :  { %s1571_s17 = smov 0   ;;  %s1573_s18 = smov 0  }
   0x3   :  { %s1575_s19 = smov 0   ;;  %s1577_s20 = smov 0  }
   0x4 LB: > { %s1329_s21 = sadd.s32 4294967295, %s1535_s20   ;;  %s1330_s22 = sadd.s32 4294967294, %s1535_s20   ;;  %s1535_s20 = sphi %s1577_s20, %s18_s20   ;;  %s1531_s19 = sphi %s1575_s19, %s2425_s19   ;;  %s1527_s18 = sphi %s1573_s18, %s2424_s18   ;;  %s1523_s17 = sphi %s1571_s17, %s2423_s17   ;;  %s1519_s16 = sphi %s1569_s16, %s2422_s16   ;;  %s1515_s15 = sphi %s1567_s15, %s2421_s15  }
   0x5   : > { %s30_s23 = sadd.s32 1, %s1531_s19  ;;  %s109_s24 = sadd.s32 1, %s1523_s17 }
   0x6   : > { %p32_p0 = scmp.ge.s32.totalorder %s30_s23, 2  ;;  %p119_p1 = scmp.ne.s32.totalorder %s1523_s17, %s1519_s16 }
   0x7   : > { %p120_p2 = scmp.eq.s32.totalorder %s1329_s21, 1  ;;  %p125_p3 = scmp.ne.s32.totalorder %s1519_s16, %s1515_s15 }
   0x8   : > { %s2427_s23 = smov (%p32_p0, %s30_s23), 0  ;;  %p126_p5 = scmp.eq.s32.totalorder %s1330_s22, 1 }
   0x9   : > { %p1607_p4 = por %p120_p2, %p119_p1  ;;  %s104_s26 = ssub.s32 %s1531_s19, %s2427_s23 }
   0xa   : > { %p1333_p6 = scmp.ge.s32.totalorder %s1535_s20, 1  ;;  %p107_p7 = scmp.eq.s32.totalorder %s104_s26, 0 }
   0xb   : > { %p1614_p8 = por %p126_p5, %p125_p3  ;;  %p191_p9 = scmp.lt.s32.totalorder %s1535_s20, 3 }
   0xc   : > { %s1620_s28 = scalar_select %p107_p7, %s1523_s17, %s109_s24  }
   0xd   : > { %p192_p10 = pnand %p1333_p6, %p191_p9 }
   0xe   : > { %p231_p11 = scmp.lt.s32.totalorder (!%p192_p10), %s1527_s18, 1  ;;  %v1537_v0 = vmov (!%p192_p10), 0.0   ;;  %v1538_v1 = vmov (!%p192_p10), 0   ;;  %v263_v2 = vld [vmem:[%s2412_s2 + $0x10] sm:$0xff] (!%p192_p10)  ;;  %v261_v3 = vld [vmem:[%s2412_s2] sm:$0xff] (!%p192_p10)  ;;  %v264_v4 = vld [vmem:[%s2412_s2 + $0x18] sm:$0xff] (!%p192_p10) }
   0xf   : > { %195 = sbr.rel (%p192_p10) target bundleno = 534 (0x216), region = 32  ;;  %406 = vmatprep.mubr.f32.mxu0 (!%p192_p10), %v1537_v0  ;;  %430 = vmatprep.mubr.f32.mxu1 (!%p192_p10), %v1537_v0  ;;  %v262_v5 = vld [vmem:[%s2412_s2 + $0x8] sm:$0xff] (!%p192_p10)  ;;  %vm337_vm0 = vcmask (!%p192_p10), 1043456   ;;  %v253_v8 = vld [vmem:[%s2411_s1] sm:$0xff] (!%p192_p10)  ;;  %vm312_vm1 = vcmask (!%p192_p10), 31744   ;;  %v268_v14 = vld [vmem:[%s2412_s2 + $0x38] sm:$0xff] (!%p192_p10) }
  0x10   : > { %1419 = vset.pattern.permute.xlu1 (!%p192_p10), %v1538_v1  ;;  %1418 = vset.pattern.permute.xlu0 (!%p192_p10), %v1538_v1  ;;  %v257_v9 = vld [vmem:[%s2411_s1 + $0x20] sm:$0xff] (!%p192_p10)  ;;  %v266_v10 = vld [vmem:[%s2412_s2 + $0x28] sm:$0xff] (!%p192_p10)  ;;  %v267_v15 = vld [vmem:[%s2412_s2 + $0x30] sm:$0xff] (!%p192_p10)  ;;  %s1356_s22 = sshll.u32 (!%p192_p10), %s1527_s18, 9  ;;  %s1539_s7 = smov (!%p192_p10), [#allocation3]  }
  0x11   : > { %282 = vperm.xlu1 (!%p192_p10), %1419, %v263_v2   ;;  %272 = vperm.xlu0 (!%p192_p10), %1418, %v261_v3   ;;  %v265_v11 = vld [vmem:[%s2412_s2 + $0x20] sm:$0xff] (!%p192_p10)  ;;  %v254_v12 = vld [vmem:[%s2411_s1 + $0x8] sm:$0xff] (!%p192_p10)  ;;  %v255_v16 = vld [vmem:[%s2411_s1 + $0x10] sm:$0xff] (!%p192_p10)  ;;  %s2356_s5 = scalar_lea.hbm (!%p192_p10), %s2413_s3, %s1356_s22 }
  0x12   : > { %v258_v13 = vld [vmem:[%s2411_s1 + $0x28] sm:$0xff] (!%p192_p10)  ;;  %v259_v17 = vld [vmem:[%s2411_s1 + $0x30] sm:$0xff] (!%p192_p10)  ;;  %v256_v18 = vld [vmem:[%s2411_s1 + $0x18] sm:$0xff] (!%p192_p10) }
  0x13   : > { %v260_v19 = vld [vmem:[%s2411_s1 + $0x38] sm:$0xff] (!%p192_p10) }
  0x15   : > { %287 = vperm.xlu1 (!%p192_p10), %1419, %v264_v4   ;;  %277 = vperm.xlu0 (!%p192_p10), %1418, %v262_v5  }
  0x16   : > { %s1624_s29 = scalar_select %p231_p11, %s1527_s18, 1 }
  0x18   : > { %s1354_s8 = sshll.u32 %s1624_s29, 3  ;;  %s1355_s10 = sshll.u32 %s1624_s29, 6 }
  0x19   : > { %s238_s11 = scalar_lea.vmem %s2410_s0, %s1354_s8  ;;  %297 = vperm.xlu1 %1419, %v266_v10   ;;  %292 = vperm.xlu0 %1418, %v265_v11   ;;  %s1950_s13 = scalar_lea.vmem %s2414_s4, %s1355_s10 }
  0x1a   : > { %v269_v6 = vld [vmem:[%s238_s11] sm:$0xff]  ;;  %s216_s29 = sand.u32 1, %s1519_s16   ;;  %s1461_s8 = sshll.u32 %s1539_s7, 4  ;;  %s1462_s8 = int_to_ptr.vmem [resolvable:$false] %s1461_s8 }
  0x1b   : > { %v311_v7 = vcombine.high %v269_v6, %v269_v6  ;;  %s1334_s14 = sshll.u32 %s216_s29, 5  ;;  %s2364_s18 = scalar_lea.sflag [#allocation4], %s216_s29 }
  0x1c   : > { %s2274_s21 = scalar_lea.vmem [#allocation3], %s1334_s14  ;;  %s1463_s9 = scalar_lea.vmem %s1462_s8, 1024 }
  0x1d   : > { %1339 = vmatprep.subr.msk.mxu0 %vm337_vm0, %v311_v7  ;;  %1357 = vmatprep.subr.msk.mxu1 %vm337_vm0, %v311_v7  ;;  %s1209_s24 = sshll.u32 %s2274_s21, 4  ;;  %s2358_s24 = int_to_ptr.vmem [resolvable:$true] %s1209_s24 }
  0x1e   : > { %1340 = vmatpush1.msk.msra.mxu0 %vm337_vm0, %v269_v6  ;;  %1358 = vmatpush1.msk.msra.mxu1 %vm337_vm0, %v269_v6  ;;  %s1457_s6 = scalar_lea.vmem %s2358_s24, 512  ;;  %p1464_p1 = scmp.lt.s32.totalorder %s2358_s24, %s1462_s8 }
  0x1f   : > { %1341 = vmatmul.mubr.msk.f32.vlgmr.msra.gmra.mrb[0].mxu0 %vm312_vm1, %v253_v8  ;;  %1345 = vmatmul.mubr.msk.f32.vlgmr.msra.gmra.mrb[0].mxu1 %vm312_vm1, %v257_v9  ;;  %p1458_p12 = scmp.ne.s32.totalorder %s2358_s24, %s1457_s6  ;;  %p1465_p2 = scmp.lt.s32.totalorder %s1463_s9, %s1457_s6 }
  0x20   : > { %412 = vmatprep.mubr.f32.mxu0 %v1537_v0  ;;  %436 = vmatprep.mubr.f32.mxu1 %v1537_v0 }
  0x21   : > { %307 = vperm.xlu1 %1419, %v268_v14   ;;  %302 = vperm.xlu0 %1418, %v267_v15   ;;  %p1459_p13 = pnand %p1458_p12, %p1607_p4  ;;  %p1466_p3 = por %p1465_p2, %p1464_p1 }
  0x23   : > { %1342 = vmatmul.mubr.msk.f32.gmra.mrb[2].mxu0 %vm312_vm1, %v254_v12  ;;  %1346 = vmatmul.mubr.msk.f32.gmra.mrb[2].mxu1 %vm312_vm1, %v258_v13  ;;  %v471_v12 = vlaneseq  ;;  %p1460_p0 = pneg %p1459_p13 }
  0x24   : > { %418 = vmatprep.mubr.f32.mxu0 %v1537_v0  ;;  %442 = vmatprep.mubr.f32.mxu1 %v1537_v0 }
  0x25   : > { %p1467_p5 = pnand %p1466_p3, %p1460_p0 }
  0x27   : > { %1343 = vmatmul.mubr.msk.f32.gmra.mrb[4].mxu0 %vm312_vm1, %v255_v16  ;;  %1347 = vmatmul.mubr.msk.f32.gmra.mrb[4].mxu1 %vm312_vm1, %v259_v17  ;;  %v1736_v17 = vshrl.u32 %v471_v12, 7 }
  0x28   : > { %424 = vmatprep.mubr.f32.mxu0 %v1537_v0  ;;  %448 = vmatprep.mubr.f32.mxu1 %v1537_v0 }
  0x2b   : > { %1344 = vmatmul.mubr.msk.f32.gmra.mrb[6].mxu0 %vm312_vm1, %v256_v18  ;;  %1348 = vmatmul.mubr.msk.f32.gmra.mrb[6].mxu1 %vm312_vm1, %v260_v19 }
  0x90   : > { %v273_v20 = vpop.permute.xlu0 %272  ;;  %v283_v21 = vpop.permute.xlu1 %282 }
  0x94   : > { %v278_v22 = vpop.permute.xlu0 %277  ;;  %v288_v27 = vpop.permute.xlu1 %287 }
  0x98   : > { %v293_v28 = vpop.permute.xlu0 %292  ;;  %v298_v39 = vpop.permute.xlu1 %297 }
  0xa0   : > { %v303_v43 = vpop.permute.xlu0 %302  ;;  %v308_v60 = vpop.permute.xlu1 %307 }
  0xf2   : > { %v408_v23 = vpop.f32.mrb[0].mxu0  ;;  %v432_v24 = vpop.f32.mrb[0].mxu1 }
  0xf3   : > { %v410_v25 = vpop.f32.mrb[1].mxu0  ;;  %v434_v26 = vpop.f32.mrb[1].mxu1  ;;  %v1688_v35 = vadd.f32 %v408_v23, %v273_v20  ;;  %v1696_v42 = vadd.f32 %v432_v24, %v293_v28  ;;  %v1742_v23 = vadd.s32 16, %v1736_v17  ;;  %v1745_v24 = vadd.s32 24, %v1736_v17 }
  0xf4   : > { %v1692_v40 = vadd.f32 %v410_v25, %v273_v20  ;;  %v1709_v54 = vadd.f32 %v434_v26, %v293_v28  ;;  %v1748_v25 = vadd.s32 32, %v1736_v17  ;;  %v1754_v28 = vadd.s32 48, %v1736_v17 }
  0xf6   : > { %v414_v29 = vpop.f32.mrb[2].mxu0  ;;  %v438_v30 = vpop.f32.mrb[2].mxu1 }
  0xf7   : > { %v416_v31 = vpop.f32.mrb[3].mxu0  ;;  %v440_v32 = vpop.f32.mrb[3].mxu1  ;;  %v1702_v48 = vadd.f32 %v414_v29, %v278_v22  ;;  %v1715_v57 = vadd.f32 %v438_v30, %v298_v39  ;;  %v1757_v29 = vadd.s32 56, %v1736_v17 }
  0xf8   : > { %v1711_v55 = vadd.f32 %v416_v31, %v278_v22  ;;  %v1720_v61 = vadd.f32 %v440_v32, %v298_v39  ;;  %v1739_v22 = vadd.s32 8, %v1736_v17 }
  0xfa   : > { %v420_v33 = vpop.f32.mrb[4].mxu0  ;;  %v444_v34 = vpop.f32.mrb[4].mxu1 }
  0xfb   : > { %v1690_v36 = vadd.f32 %v420_v33, %v283_v21  ;;  %v422_v37 = vpop.f32.mrb[5].mxu0  ;;  %v446_v38 = vpop.f32.mrb[5].mxu1  ;;  %v1704_v49 = vadd.f32 %v444_v34, %v303_v43 }
  0xfc   : > { %v1694_v41 = vadd.f32 %v422_v37, %v283_v21  ;;  %v1728_v3 = vadd.f32 %v446_v38, %v303_v43 }
  0xfd   : > { %v496_v44 = vmax.f32 %v1688_v35, %v1690_v36 }
  0xfe   : > { %v509_v45 = vmax.f32 %v1692_v40, %v1694_v41  ;;  %v426_v46 = vpop.f32.mrb[6].mxu0  ;;  %v450_v47 = vpop.f32.mrb[6].mxu1 }
  0xff   : > { %v498_v50 = vmax.f32 %v496_v44, %v1696_v42  ;;  %v1707_v51 = vadd.f32 %v426_v46, %v288_v27  ;;  %v428_v52 = vpop.f32.mrb[7].mxu0  ;;  %v452_v53 = vpop.f32.mrb[7].mxu1  ;;  %v1725_v0 = vadd.f32 %v450_v47, %v308_v60 }
 0x100   : > { %v1713_v56 = vadd.f32 %v428_v52, %v288_v27  ;;  %v511_v62 = vmax.f32 %v509_v45, %v1709_v54  ;;  %v1730_v4 = vadd.f32 %v452_v53, %v308_v60  ;;  %v1751_v27 = vadd.s32 40, %v1736_v17 }
 0x101   : > { %v500_v58 = vmax.f32 %v498_v50, %v1704_v49  ;;  %v497_v59 = vmax.f32 %v1702_v48, %v1707_v51 }
 0x102   : > { %v510_v63 = vmax.f32 %v1711_v55, %v1713_v56  ;;  %v513_v7 = vmax.f32 %v511_v62, %v1728_v3 }
 0x103   : > { %v499_v2 = vmax.f32 %v497_v59, %v1715_v57 }
 0x104   : > { %v512_v5 = vmax.f32 %v510_v63, %v1720_v61 }
 0x105   : > { %v501_v6 = vmax.f32 %v499_v2, %v1725_v0 }
 0x106   : > { %v514_v8 = vmax.f32 %v512_v5, %v1730_v4 }
 0x107   : > { %v502_v9 = vmax.f32 %v500_v58, %v501_v6 }
 0x108   : > { %v515_v10 = vmax.f32 %v513_v7, %v514_v8 }
 0x109   : > { %v503_v11 = vrot.slane %v502_v9, 4 }
 0x10a   : > { %v516_v13 = vrot.slane %v515_v10, 4 }
 0x10b   : > { %v504_v14 = vmax.f32 %v502_v9, %v503_v11 }
 0x10c   : > { %v517_v15 = vmax.f32 %v515_v10, %v516_v13 }
 0x10d   : > { %v505_v16 = vrot.slane %v504_v14, 2 }
 0x10e   : > { %v518_v18 = vrot.slane %v517_v15, 2 }
 0x10f   : > { %v506_v19 = vmax.f32 %v504_v14, %v505_v16 }
 0x110   : > { %v519_v20 = vmax.f32 %v517_v15, %v518_v18 }
 0x111   : > { %v507_v21 = vrot.slane %v506_v19, 1 }
 0x112   : > { %v520_v30 = vrot.slane %v519_v20, 1 }
 0x113   : > { %v508_v26 = vmax.f32 %v506_v19, %v507_v21 }
 0x114   : > { %v1769_v52 = vmax.f32 %v519_v20, %v520_v30 }
 0x115   : > { %v522_v31 = vsub.f32 %v1688_v35, %v508_v26  ;;  %v524_v32 = vsub.f32 %v1702_v48, %v508_v26  ;;  %v526_v33 = vsub.f32 %v1690_v36, %v508_v26  ;;  %v528_v34 = vsub.f32 %v1707_v51, %v508_v26 }
 0x116   : > { %v530_v37 = vsub.f32 %v1696_v42, %v508_v26  ;;  %v532_v38 = vsub.f32 %v1715_v57, %v508_v26  ;;  %v534_v39 = vsub.f32 %v1704_v49, %v508_v26  ;;  %v536_v43 = vsub.f32 %v1725_v0, %v508_v26 }
 0x117   : > { %v538_v44 = vmul.f32 1.442695, %v522_v31  ;;  %v542_v45 = vmul.f32 1.442695, %v524_v32  ;;  %v546_v46 = vmul.f32 1.442695, %v526_v33  ;;  %vm630_vm2 = vcmp.eq.f32.partialorder %v1688_v35, %v508_v26 }
 0x118   : > { %v550_v47 = vmul.f32 1.442695, %v528_v34  ;;  %v554_v50 = vmul.f32 1.442695, %v530_v37  ;;  %vm632_vm3 = vcmp.eq.f32.partialorder %v1702_v48, %v508_v26  ;;  %v558_v53 = vmul.f32 1.442695, %v532_v38 }
 0x119   : > { %1421 = vpow2.f32 %v538_v44  ;;  %v562_v58 = vmul.f32 1.442695, %v534_v39  ;;  %vm634_vm4 = vcmp.eq.f32.partialorder %v1690_v36, %v508_v26  ;;  %vm636_vm5 = vcmp.eq.f32.partialorder %v1707_v51, %v508_v26 }
 0x11a   : > { %1423 = vpow2.f32 %v542_v45  ;;  %vm638_vm6 = vcmp.eq.f32.partialorder %v1696_v42, %v508_v26  ;;  %vm640_vm7 = vcmp.eq.f32.partialorder %v1715_v57, %v508_v26  ;;  %vm642_vm8 = vcmp.eq.f32.partialorder %v1704_v49, %v508_v26 }
 0x11b   : > { %1425 = vpow2.f32 %v546_v46  ;;  %vm644_vm9 = vcmp.eq.f32.partialorder %v1725_v0, %v508_v26  ;;  %v646_v59 = vsel %vm630_vm2, %v1736_v17, 64  ;;  %v648_v60 = vsel %vm632_vm3, %v1739_v22, 64 }
 0x11c   : > { %1427 = vpow2.f32 %v550_v47  ;;  %v650_v62 = vsel %vm634_vm4, %v1742_v23, 64  ;;  %v652_v63 = vsel %vm636_vm5, %v1745_v24, 64  ;;  %v566_v2 = vmul.f32 1.442695, %v536_v43 }
 0x11d   : > { %1429 = vpow2.f32 %v554_v50  ;;  %v654_v5 = vsel %vm638_vm6, %v1748_v25, 64  ;;  %v656_v6 = vsel %vm640_vm7, %v1751_v27, 64  ;;  %v658_v7 = vsel %vm642_vm8, %v1754_v28, 64 }
 0x11e   : > { %1431 = vpow2.f32 %v558_v53  ;;  %vm662_vm10 = vcmp.lt.s32.totalorder %v646_v59, %v650_v62  ;;  %vm664_vm11 = vcmp.lt.s32.totalorder %v648_v60, %v652_v63  ;;  %v660_v8 = vsel %vm644_vm9, %v1757_v29, 64 }
 0x11f   : > { %1433 = vpow2.f32 %v562_v58  ;;  %v663_v9 = vsel %vm662_vm10, %v646_v59, %v650_v62  ;;  %v665_v10 = vsel %vm664_vm11, %v648_v60, %v652_v63  ;;  %v523_v11 = vsub.f32 %v1692_v40, %v1769_v52 }
 0x120   : > { %vm666_vm12 = vcmp.lt.s32.totalorder %v663_v9, %v654_v5  ;;  %vm668_vm13 = vcmp.lt.s32.totalorder %v665_v10, %v656_v6  ;;  %v525_v12 = vsub.f32 %v1711_v55, %v1769_v52  ;;  %v527_v15 = vsub.f32 %v1694_v41, %v1769_v52 }
 0x121   : > { %v667_v13 = vsel %vm666_vm12, %v663_v9, %v654_v5  ;;  %v669_v14 = vsel %vm668_vm13, %v665_v10, %v656_v6  ;;  %v529_v16 = vsub.f32 %v1713_v56, %v1769_v52  ;;  %v531_v18 = vsub.f32 %v1709_v54, %v1769_v52 }
 0x122   : > { %vm670_vm14 = vcmp.lt.s32.totalorder %v667_v13, %v658_v7  ;;  %vm672_vm15 = vcmp.lt.s32.totalorder %v669_v14, %v660_v8  ;;  %v533_v19 = vsub.f32 %v1720_v61, %v1769_v52  ;;  %v535_v30 = vsub.f32 %v1728_v3, %v1769_v52 }
 0x123   : > { %v1799_v20 = vpop.eup %1421  ;;  %v671_v21 = vsel %vm670_vm14, %v667_v13, %v658_v7  ;;  %v673_v26 = vsel %vm672_vm15, %v669_v14, %v660_v8  ;;  %v537_v31 = vsub.f32 %v1730_v4, %v1769_v52  ;;  %v540_v33 = vmul.f32 1.442695, %v523_v11 }
 0x124   : > { %v1805_v32 = vpop.eup %1423  ;;  %vm674_vm0 = vcmp.lt.s32.totalorder %v671_v21, %v673_v26  ;;  %v544_v34 = vmul.f32 1.442695, %v525_v12  ;;  %v548_v37 = vmul.f32 1.442695, %v527_v15  ;;  %1435 = vpow2.f32 %v566_v2 }
 0x125   : > { %v1807_v38 = vpop.eup %1425  ;;  %v570_v39 = vadd.f32 %v1805_v32, %v1799_v20  ;;  %v675_v43 = vsel %vm674_vm0, %v671_v21, %v673_v26  ;;  %v552_v44 = vmul.f32 1.442695, %v529_v16  ;;  %1437 = vpow2.f32 %v540_v33 }
 0x126   : > { %v1811_v45 = vpop.eup %1427  ;;  %v676_v46 = vrot.slane %v675_v43, 4  ;;  %v556_v47 = vmul.f32 1.442695, %v531_v18  ;;  %v560_v50 = vmul.f32 1.442695, %v533_v19  ;;  %1439 = vpow2.f32 %v544_v34 }
 0x127   : > { %v1813_v53 = vpop.eup %1429  ;;  %v571_v58 = vadd.f32 %v1807_v38, %v570_v39  ;;  %v564_v59 = vmul.f32 1.442695, %v535_v30  ;;  %v568_v60 = vmul.f32 1.442695, %v537_v31  ;;  %1441 = vpow2.f32 %v548_v37 }
 0x128   : > { %v1816_v62 = vpop.eup %1431  ;;  %vm677_vm1 = vcmp.lt.s32.totalorder %v675_v43, %v676_v46  ;;  %vm631_vm2 = vcmp.eq.f32.partialorder %v1692_v40, %v1769_v52  ;;  %vm633_vm3 = vcmp.eq.f32.partialorder %v1711_v55, %v1769_v52  ;;  %1443 = vpow2.f32 %v552_v44 }
 0x129   : > { %v1822_v63 = vpop.eup %1433  ;;  %v572_v2 = vadd.f32 %v1811_v45, %v571_v58  ;;  %v678_v5 = vsel %vm677_vm1, %v675_v43, %v676_v46  ;;  %vm635_vm4 = vcmp.eq.f32.partialorder %v1694_v41, %v1769_v52  ;;  %1445 = vpow2.f32 %v556_v47 }
 0x12a   : > { %v679_v6 = vrot.slane %v678_v5, 2  ;;  %vm637_vm5 = vcmp.eq.f32.partialorder %v1713_v56, %v1769_v52  ;;  %vm639_vm6 = vcmp.eq.f32.partialorder %v1709_v54, %v1769_v52  ;;  %1447 = vpow2.f32 %v560_v50 }
 0x12b   : > { %v573_v7 = vadd.f32 %v1813_v53, %v572_v2  ;;  %vm641_vm7 = vcmp.eq.f32.partialorder %v1720_v61, %v1769_v52  ;;  %vm643_vm8 = vcmp.eq.f32.partialorder %v1728_v3, %v1769_v52  ;;  %1449 = vpow2.f32 %v564_v59 }
 0x12c   : > { %vm680_vm9 = vcmp.lt.s32.totalorder %v678_v5, %v679_v6  ;;  %vm645_vm10 = vcmp.eq.f32.partialorder %v1730_v4, %v1769_v52  ;;  %v647_v8 = vsel %vm631_vm2, %v1736_v17, 64  ;;  %v649_v11 = vsel %vm633_vm3, %v1739_v22, 64 }
 0x12d   : > { %v574_v9 = vadd.f32 %v1816_v62, %v573_v7  ;;  %v681_v10 = vsel %vm680_vm9, %v678_v5, %v679_v6  ;;  %v651_v12 = vsel %vm635_vm4, %v1742_v23, 64  ;;  %1451 = vpow2.f32 %v568_v60 }
 0x12e   : > { %v682_v13 = vrot.slane %v681_v10, 1  ;;  %v653_v14 = vsel %vm637_vm5, %v1745_v24, 64  ;;  %v655_v15 = vsel %vm639_vm6, %v1748_v25, 64  ;;  %v1859_v16 = vpop.eup %1435  ;;  %v657_v19 = vsel %vm641_vm7, %v1751_v27, 64 }
 0x12f   : > { %v575_v18 = vadd.f32 %v1822_v63, %v574_v9  ;;  %v659_v21 = vsel %vm643_vm8, %v1754_v28, 64  ;;  %vm685_vm11 = vcmp.lt.s32.totalorder %v647_v8, %v651_v12  ;;  %v1870_v26 = vpop.eup %1437  ;;  %v661_v30 = vsel %vm645_vm10, %v1757_v29, 64 }
 0x130   : > { %vm683_vm12 = vcmp.lt.s32.totalorder %v681_v10, %v682_v13  ;;  %v686_v31 = vsel %vm685_vm11, %v647_v8, %v651_v12  ;;  %vm687_vm13 = vcmp.lt.s32.totalorder %v649_v11, %v653_v14  ;;  %v1876_v33 = vpop.eup %1439 }
 0x131   : > { %v576_v34 = vadd.f32 %v1859_v16, %v575_v18  ;;  %v684_v37 = vsel %vm683_vm12, %v681_v10, %v682_v13  ;;  %v688_v39 = vsel %vm687_vm13, %v649_v11, %v653_v14  ;;  %vm689_vm14 = vcmp.lt.s32.totalorder %v686_v31, %v655_v15  ;;  %v1879_v43 = vpop.eup %1441 }
 0x132   : > { %vm708_vm15 = vcmp.eq.s32.totalorder %v1736_v17, %v684_v37  ;;  %vm710_vm0 = vcmp.eq.s32.totalorder %v1739_v22, %v684_v37  ;;  %vm712_vm1 = vcmp.eq.s32.totalorder %v1742_v23, %v684_v37  ;;  %vm714_vm2 = vcmp.eq.s32.totalorder %v1745_v24, %v684_v37  ;;  %v1885_v52 = vpop.eup %1443 }
 0x133   : > { %v577_v44 = vrot.slane %v576_v34, 4  ;;  %vm716_vm3 = vcmp.eq.s32.totalorder %v1748_v25, %v684_v37  ;;  %vm718_vm4 = vcmp.eq.s32.totalorder %v1751_v27, %v684_v37  ;;  %vm720_vm5 = vcmp.eq.s32.totalorder %v1754_v28, %v684_v37  ;;  %v1890_v46 = vpop.eup %1445 }
 0x134   : > { %vm722_vm6 = vcmp.eq.s32.totalorder %v1757_v29, %v684_v37  ;;  %v1894_v47 = vsel %vm708_vm15, -inf, %v1688_v35  ;;  %v1897_v50 = vsel %vm710_vm0, -inf, %v1702_v48  ;;  %v1900_v58 = vsel %vm712_vm1, -inf, %v1690_v36  ;;  %v1902_v59 = vpop.eup %1447 }
 0x135   : > { %v578_v60 = vadd.f32 %v577_v44, %v576_v34  ;;  %v1905_v2 = vsel %vm714_vm2, -inf, %v1707_v51  ;;  %v1908_v5 = vsel %vm716_vm3, -inf, %v1696_v42  ;;  %v1911_v6 = vsel %vm718_vm4, -inf, %v1715_v57  ;;  %v1913_v35 = vpop.eup %1449 }
 0x136   : > { %v1916_v48 = vsel %vm720_vm5, -inf, %v1704_v49  ;;  %v1919_v36 = vsel %vm722_vm6, -inf, %v1725_v0  ;;  %v740_v7 = vmax.f32 %v1894_v47, %v1900_v58  ;;  %v741_v51 = vmax.f32 %v1897_v50, %v1905_v2 }
 0x137   : > { %v579_v8 = vrot.slane %v578_v60, 2  ;;  %v583_v42 = vadd.f32 %v1876_v33, %v1870_v26  ;;  %v690_v57 = vsel %vm689_vm14, %v686_v31, %v655_v15  ;;  %vm691_vm7 = vcmp.lt.s32.totalorder %v688_v39, %v657_v19  ;;  %v1928_v9 = vpop.eup %1451 }
 0x138   : > { %v742_v49 = vmax.f32 %v740_v7, %v1908_v5  ;;  %v743_v0 = vmax.f32 %v741_v51, %v1911_v6  ;;  %v692_v10 = vsel %vm691_vm7, %v688_v39, %v657_v19  ;;  %vm693_vm8 = vcmp.lt.s32.totalorder %v690_v57, %v659_v21 }
 0x139   : > { %v580_v11 = vadd.f32 %v579_v8, %v578_v60  ;;  %v584_v12 = vadd.f32 %v1879_v43, %v583_v42  ;;  %v694_v13 = vsel %vm693_vm8, %v690_v57, %v659_v21  ;;  %vm695_vm9 = vcmp.lt.s32.totalorder %v692_v10, %v661_v30 }
 0x13a   : > { %v744_v14 = vmax.f32 %v742_v49, %v1916_v48  ;;  %v745_v18 = vmax.f32 %v743_v0, %v1919_v36  ;;  %v696_v34 = vsel %vm695_vm9, %v692_v10, %v661_v30 }
 0x13b   : > { %v581_v15 = vrot.slane %v580_v11, 1  ;;  %v585_v31 = vadd.f32 %v1885_v52, %v584_v12  ;;  %vm697_vm10 = vcmp.lt.s32.totalorder %v694_v13, %v696_v34 }
 0x13c   : > { %v746_v37 = vmax.f32 %v744_v14, %v745_v18  ;;  %v698_v44 = vsel %vm697_vm10, %v694_v13, %v696_v34 }
 0x13d   : > { %v582_v7 = vadd.f32 %v581_v15, %v580_v11  ;;  %v586_v19 = vadd.f32 %v1890_v46, %v585_v31  ;;  %v699_v39 = vrot.slane %v698_v44, 4 }
 0x13e   : > { %v747_v60 = vrot.slane %v746_v37, 4 }
 0x13f   : > { %1453 = vrcp.f32 %v582_v7  ;;  %v587_v21 = vadd.f32 %v1902_v59, %v586_v19  ;;  %vm700_vm11 = vcmp.lt.s32.totalorder %v698_v44, %v699_v39 }
 0x140   : > { %v748_v51 = vmax.f32 %v746_v37, %v747_v60  ;;  %v701_v8 = vsel %vm700_vm11, %v698_v44, %v699_v39 }
 0x141   : > { %v588_v30 = vadd.f32 %v1913_v35, %v587_v21  ;;  %v702_v42 = vrot.slane %v701_v8, 2 }
 0x142   : > { %v749_v57 = vrot.slane %v748_v51, 2 }
 0x143   : > { %v589_v49 = vadd.f32 %v1928_v9, %v588_v30  ;;  %vm703_vm12 = vcmp.lt.s32.totalorder %v701_v8, %v702_v42 }
 0x144   : > { %v750_v0 = vmax.f32 %v748_v51, %v749_v57  ;;  %v704_v10 = vsel %vm703_vm12, %v701_v8, %v702_v42 }
 0x145   : > { %v590_v11 = vrot.slane %v589_v49, 4  ;;  %v705_v12 = vrot.slane %v704_v10, 1 }
 0x146   : > { %v751_v13 = vrot.slane %v750_v0, 1 }
 0x147   : > { %v591_v14 = vadd.f32 %v590_v11, %v589_v49  ;;  %vm706_vm13 = vcmp.lt.s32.totalorder %v704_v10, %v705_v12 }
 0x148   : > { %v752_v18 = vmax.f32 %v750_v0, %v751_v13  ;;  %v1941_v31 = vsel %vm706_vm13, %v704_v10, %v705_v12 }
 0x149   : > { %v1454_v34 = vpop.eup %1453  ;;  %v592_v15 = vrot.slane %v591_v14, 2  ;;  %vm709_vm6 = vcmp.eq.s32.totalorder %v1736_v17, %v1941_v31  ;;  %vm711_vm7 = vcmp.eq.s32.totalorder %v1739_v22, %v1941_v31  ;;  %vm713_vm8 = vcmp.eq.s32.totalorder %v1742_v23, %v1941_v31 }
 0x14a   : > { %v598_v37 = vmul.f32 %v1454_v34, %v1799_v20  ;;  %v600_v44 = vmul.f32 %v1454_v34, %v1805_v32  ;;  %v602_v7 = vmul.f32 %v1454_v34, %v1807_v38  ;;  %v604_v19 = vmul.f32 %v1454_v34, %v1811_v45 }
 0x14b   : > { %v606_v39 = vmul.f32 %v1454_v34, %v1813_v53  ;;  %v608_v60 = vmul.f32 %v1454_v34, %v1816_v62  ;;  %v610_v21 = vmul.f32 %v1454_v34, %v1822_v63  ;;  %v612_v20 = vmul.f32 %v1454_v34, %v1859_v16 }
 0x14c   : > { %v614_v32 = vpack.c.bf16 %v600_v44, %v598_v37  ;;  %v616_v38 = vpack.c.bf16 %v604_v19, %v602_v7  ;;  %vm766_vm14 = vcmp.eq.f32.partialorder %v1894_v47, %v752_v18  ;;  %vm768_vm15 = vcmp.eq.f32.partialorder %v1897_v50, %v752_v18 }
 0x14d   : > { %v618_v45 = vpack.c.bf16 %v608_v60, %v606_v39  ;;  %v620_v51 = vpack.c.bf16 %v612_v20, %v610_v21  ;;  %vm770_vm0 = vcmp.eq.f32.partialorder %v1900_v58, %v752_v18  ;;  %vm772_vm1 = vcmp.eq.f32.partialorder %v1905_v2, %v752_v18 }
 0x14e   : > { %622 = vst [vmem:[%s1950_s13] sm:$0xff] %v614_v32  ;;  %624 = vst [vmem:[%s1950_s13 + $0x10] sm:$0xff] %v616_v38  ;;  %vm774_vm2 = vcmp.eq.f32.partialorder %v1908_v5, %v752_v18  ;;  %vm776_vm3 = vcmp.eq.f32.partialorder %v1911_v6, %v752_v18  ;;  %vm778_vm4 = vcmp.eq.f32.partialorder %v1916_v48, %v752_v18  ;;  %v782_v53 = vsel %vm766_vm14, %v1736_v17, 64 }
 0x14f   : > { %vm780_vm5 = vcmp.eq.f32.partialorder %v1919_v36, %v752_v18  ;;  %626 = vst [vmem:[%s1950_s13 + $0x20] sm:$0xff] %v618_v45  ;;  %628 = vst [vmem:[%s1950_s13 + $0x30] sm:$0xff] %v620_v51  ;;  %v784_v62 = vsel %vm768_vm15, %v1739_v22, 64  ;;  %v786_v63 = vsel %vm770_vm0, %v1742_v23, 64  ;;  %v788_v16 = vsel %vm772_vm1, %v1745_v24, 64 }
 0x150   : > { %v790_v8 = vsel %vm774_vm2, %v1748_v25, 64  ;;  %v792_v30 = vsel %vm776_vm3, %v1751_v27, 64  ;;  %vm798_vm9 = vcmp.lt.s32.totalorder %v782_v53, %v786_v63  ;;  %vm800_vm10 = vcmp.lt.s32.totalorder %v784_v62, %v788_v16 }
 0x151   : > { %v593_v42 = vadd.f32 %v592_v15, %v591_v14  ;;  %v794_v57 = vsel %vm778_vm4, %v1754_v28, 64  ;;  %v796_v49 = vsel %vm780_vm5, %v1757_v29, 64  ;;  %v799_v0 = vsel %vm798_vm9, %v782_v53, %v786_v63 }
 0x152   : > { %v801_v10 = vsel %vm800_vm10, %v784_v62, %v788_v16  ;;  %vm802_vm11 = vcmp.lt.s32.totalorder %v799_v0, %v790_v8  ;;  %vm715_vm13 = vcmp.eq.s32.totalorder %v1745_v24, %v1941_v31  ;;  %vm717_vm14 = vcmp.eq.s32.totalorder %v1748_v25, %v1941_v31 }
 0x153   : > { %vm804_vm12 = vcmp.lt.s32.totalorder %v801_v10, %v792_v30  ;;  %v594_v11 = vrot.slane %v593_v42, 1  ;;  %v803_v12 = vsel %vm802_vm11, %v799_v0, %v790_v8  ;;  %v1994_v14 = vsel %vm709_vm6, -inf, %v1692_v40 }
 0x154   : > { %v805_v13 = vsel %vm804_vm12, %v801_v10, %v792_v30  ;;  %vm806_vm15 = vcmp.lt.s32.totalorder %v803_v12, %v794_v57  ;;  %v2000_v34 = vsel %vm711_vm7, -inf, %v1711_v55  ;;  %v2006_v44 = vsel %vm713_vm8, -inf, %v1694_v41 }
 0x155   : > { %vm808_vm0 = vcmp.lt.s32.totalorder %v805_v13, %v796_v49  ;;  %v595_v18 = vadd.f32 %v594_v11, %v593_v42  ;;  %v807_v15 = vsel %vm806_vm15, %v803_v12, %v794_v57  ;;  %v2009_v40 = vsel %vm715_vm13, -inf, %v1713_v56 }
 0x156   : > { %v809_v37 = vsel %vm808_vm0, %v805_v13, %v796_v49  ;;  %vm719_vm2 = vcmp.eq.s32.totalorder %v1751_v27, %v1941_v31  ;;  %vm721_vm3 = vcmp.eq.s32.totalorder %v1754_v28, %v1941_v31  ;;  %v753_v55 = vmax.f32 %v1994_v14, %v2006_v44 }
 0x157   : > { %vm810_vm1 = vcmp.lt.s32.totalorder %v807_v15, %v809_v37  ;;  %1455 = vrcp.f32 %v595_v18  ;;  %vm723_vm4 = vcmp.eq.s32.totalorder %v1757_v29, %v1941_v31  ;;  %v2023_v41 = vsel %vm717_vm14, -inf, %v1709_v54 }
 0x158   : > { %v811_v7 = vsel %vm810_vm1, %v807_v15, %v809_v37  ;;  %v754_v56 = vmax.f32 %v2000_v34, %v2009_v40  ;;  %v2028_v39 = vsel %vm719_vm2, -inf, %v1720_v61  ;;  %v755_v60 = vmax.f32 %v753_v55, %v2023_v41 }
 0x159   : > { %v812_v19 = vrot.slane %v811_v7, 4  ;;  %v2032_v21 = vsel %vm721_vm3, -inf, %v1728_v3  ;;  %v2036_v38 = vsel %vm723_vm4, -inf, %v1730_v4 }
 0x15a   : > { %v756_v20 = vmax.f32 %v754_v56, %v2028_v39  ;;  %v757_v54 = vmax.f32 %v755_v60, %v2032_v21 }
 0x15b   : > { %vm813_vm5 = vcmp.lt.s32.totalorder %v811_v7, %v812_v19 }
 0x15c   : > { %v814_v32 = vsel %vm813_vm5, %v811_v7, %v812_v19  ;;  %v758_v45 = vmax.f32 %v756_v20, %v2036_v38 }
 0x15d   : > { %v815_v31 = vrot.slane %v814_v32, 2 }
 0x15e   : > { %v759_v61 = vmax.f32 %v757_v54, %v758_v45 }
 0x15f   : > { %vm816_vm6 = vcmp.lt.s32.totalorder %v814_v32, %v815_v31 }
 0x160   : > { %v817_v51 = vsel %vm816_vm6, %v814_v32, %v815_v31  ;;  %v760_v63 = vrot.slane %v759_v61, 4 }
 0x161   : > { %v1456_v53 = vpop.eup %1455  ;;  %v818_v62 = vrot.slane %v817_v51, 1 }
 0x162   : > { %v599_v3 = vmul.f32 %v1456_v53, %v1870_v26  ;;  %v601_v16 = vmul.f32 %v1456_v53, %v1876_v33  ;;  %v603_v8 = vmul.f32 %v1456_v53, %v1879_v43  ;;  %v605_v4 = vmul.f32 %v1456_v53, %v1885_v52 }
 0x163   : > { %vm819_vm7 = vcmp.lt.s32.totalorder %v817_v51, %v818_v62  ;;  %v607_v30 = vmul.f32 %v1456_v53, %v1890_v46  ;;  %v609_v42 = vmul.f32 %v1456_v53, %v1902_v59  ;;  %v611_v57 = vmul.f32 %v1456_v53, %v1913_v35 }
 0x164   : > { %v820_v49 = vsel %vm819_vm7, %v817_v51, %v818_v62  ;;  %v613_v0 = vmul.f32 %v1456_v53, %v1928_v9  ;;  %v615_v10 = vpack.c.bf16 %v601_v16, %v599_v3  ;;  %v617_v26 = vpack.c.bf16 %v605_v4, %v603_v8 }
 0x165   : > { %vm844_vm8 = vcmp.eq.s32.totalorder %v1736_v17, %v820_v49  ;;  %vm846_vm9 = vcmp.eq.s32.totalorder %v1739_v22, %v820_v49  ;;  %vm848_vm10 = vcmp.eq.s32.totalorder %v1742_v23, %v820_v49  ;;  %vm850_vm11 = vcmp.eq.s32.totalorder %v1745_v24, %v820_v49 }
 0x166   : > { %vm852_vm12 = vcmp.eq.s32.totalorder %v1748_v25, %v820_v49  ;;  %vm854_vm13 = vcmp.eq.s32.totalorder %v1751_v27, %v820_v49  ;;  %vm856_vm14 = vcmp.eq.s32.totalorder %v1754_v28, %v820_v49  ;;  %vm858_vm15 = vcmp.eq.s32.totalorder %v1757_v29, %v820_v49  ;;  %623 = vst [vmem:[%s1950_s13 + $0x8] sm:$0xff] %v615_v10 }
 0x167   : > { %625 = vst [vmem:[%s1950_s13 + $0x18] sm:$0xff] %v617_v26  ;;  %v2059_v33 = vsel %vm844_vm8, -inf, %v1894_v47  ;;  %v2062_v43 = vsel %vm846_vm9, -inf, %v1897_v50  ;;  %v2065_v52 = vsel %vm848_vm10, -inf, %v1900_v58  ;;  %v2068_v46 = vsel %vm850_vm11, -inf, %v1905_v2 }
 0x168   : > { %v2071_v59 = vsel %vm852_vm12, -inf, %v1908_v5  ;;  %v2074_v35 = vsel %vm854_vm13, -inf, %v1911_v6  ;;  %v2077_v9 = vsel %vm856_vm14, -inf, %v1916_v48  ;;  %v2080_v47 = vsel %vm858_vm15, -inf, %v1919_v36 }
 0x169   : > { %v876_v50 = vmax.f32 %v2059_v33, %v2065_v52  ;;  %v877_v58 = vmax.f32 %v2062_v43, %v2068_v46  ;;  %v619_v2 = vpack.c.bf16 %v609_v42, %v607_v30  ;;  %v621_v11 = vpack.c.bf16 %v613_v0, %v611_v57 }
 0x16a   : > { %v761_v12 = vmax.f32 %v759_v61, %v760_v63 }
 0x16b   : > { %v878_v5 = vmax.f32 %v876_v50, %v2071_v59  ;;  %v879_v6 = vmax.f32 %v877_v58, %v2074_v35  ;;  %627 = vst [vmem:[%s1950_s13 + $0x28] sm:$0xff] %v619_v2  ;;  %629 = vst [vmem:[%s1950_s13 + $0x38] sm:$0xff] %v621_v11 }
 0x16c   : > { %v762_v48 = vrot.slane %v761_v12, 2 }
 0x16d   : > { %v880_v13 = vmax.f32 %v878_v5, %v2077_v9  ;;  %v881_v36 = vmax.f32 %v879_v6, %v2080_v47 }
 0x16e   : > { %v763_v18 = vmax.f32 %v761_v12, %v762_v48 }
 0x16f   : > { %v882_v15 = vmax.f32 %v880_v13, %v881_v36 }
 0x170   : > { %v764_v37 = vrot.slane %v763_v18, 1 }
 0x171   : > { %v883_v7 = vrot.slane %v882_v15, 4 }
 0x172   : > { %v765_v55 = vmax.f32 %v763_v18, %v764_v37 }
 0x173   : > { %v884_v19 = vmax.f32 %v882_v15, %v883_v7 }
 0x174   : > { %vm767_vm0 = vcmp.eq.f32.partialorder %v1994_v14, %v765_v55  ;;  %vm769_vm1 = vcmp.eq.f32.partialorder %v2000_v34, %v765_v55  ;;  %vm771_vm2 = vcmp.eq.f32.partialorder %v2006_v44, %v765_v55  ;;  %vm773_vm3 = vcmp.eq.f32.partialorder %v2009_v40, %v765_v55 }
 0x175   : > { %v885_v56 = vrot.slane %v884_v19, 2  ;;  %vm775_vm4 = vcmp.eq.f32.partialorder %v2023_v41, %v765_v55  ;;  %vm777_vm5 = vcmp.eq.f32.partialorder %v2028_v39, %v765_v55  ;;  %v783_v60 = vsel %vm767_vm0, %v1736_v17, 64 }
 0x176   : > { %v785_v20 = vsel %vm769_vm1, %v1739_v22, 64  ;;  %v787_v32 = vsel %vm771_vm2, %v1742_v23, 64  ;;  %vm779_vm6 = vcmp.eq.f32.partialorder %v2032_v21, %v765_v55  ;;  %v789_v31 = vsel %vm773_vm3, %v1745_v24, 64 }
 0x177   : > { %v886_v54 = vmax.f32 %v884_v19, %v885_v56  ;;  %vm781_vm7 = vcmp.eq.f32.partialorder %v2036_v38, %v765_v55  ;;  %v791_v45 = vsel %vm775_vm4, %v1748_v25, 64  ;;  %vm821_vm8 = vcmp.lt.s32.totalorder %v783_v60, %v787_v32 }
 0x178   : > { %vm823_vm9 = vcmp.lt.s32.totalorder %v785_v20, %v789_v31  ;;  %v793_v51 = vsel %vm777_vm5, %v1751_v27, 64  ;;  %v822_v53 = vsel %vm821_vm8, %v783_v60, %v787_v32  ;;  %v795_v63 = vsel %vm779_vm6, %v1754_v28, 64 }
 0x179   : > { %v887_v61 = vrot.slane %v886_v54, 1  ;;  %v824_v62 = vsel %vm823_vm9, %v785_v20, %v789_v31  ;;  %vm825_vm10 = vcmp.lt.s32.totalorder %v822_v53, %v791_v45  ;;  %v797_v16 = vsel %vm781_vm7, %v1757_v29, 64 }
 0x17a   : > { %vm827_vm11 = vcmp.lt.s32.totalorder %v824_v62, %v793_v51  ;;  %v826_v8 = vsel %vm825_vm10, %v822_v53, %v791_v45 }
 0x17b   : > { %v888_v3 = vmax.f32 %v886_v54, %v887_v61  ;;  %v828_v4 = vsel %vm827_vm11, %v824_v62, %v793_v51  ;;  %vm829_vm12 = vcmp.lt.s32.totalorder %v826_v8, %v795_v63 }
 0x17c   : > { %vm831_vm13 = vcmp.lt.s32.totalorder %v828_v4, %v797_v16  ;;  %v830_v10 = vsel %vm829_vm12, %v826_v8, %v795_v63 }
 0x17d   : > { %vm902_vm14 = vcmp.eq.f32.partialorder %v2059_v33, %v888_v3  ;;  %vm904_vm15 = vcmp.eq.f32.partialorder %v2062_v43, %v888_v3  ;;  %vm906_vm0 = vcmp.eq.f32.partialorder %v2065_v52, %v888_v3  ;;  %vm908_vm1 = vcmp.eq.f32.partialorder %v2068_v46, %v888_v3 }
 0x17e   : > { %vm910_vm2 = vcmp.eq.f32.partialorder %v2071_v59, %v888_v3  ;;  %vm912_vm3 = vcmp.eq.f32.partialorder %v2074_v35, %v888_v3  ;;  %vm914_vm4 = vcmp.eq.f32.partialorder %v2077_v9, %v888_v3  ;;  %vm916_vm5 = vcmp.eq.f32.partialorder %v2080_v47, %v888_v3 }
 0x17f   : > { %v918_v30 = vsel %vm902_vm14, %v1736_v17, 64  ;;  %v920_v42 = vsel %vm904_vm15, %v1739_v22, 64  ;;  %v922_v57 = vsel %vm906_vm0, %v1742_v23, 64  ;;  %v924_v49 = vsel %vm908_vm1, %v1745_v24, 64 }
 0x180   : > { %v926_v0 = vsel %vm910_vm2, %v1748_v25, 64  ;;  %vm934_vm6 = vcmp.lt.s32.totalorder %v918_v30, %v922_v57  ;;  %vm936_vm7 = vcmp.lt.s32.totalorder %v920_v42, %v924_v49  ;;  %v832_v26 = vsel %vm831_vm13, %v828_v4, %v797_v16 }
 0x181   : > { %v928_v50 = vsel %vm912_vm3, %v1751_v27, 64  ;;  %v935_v58 = vsel %vm934_vm6, %v918_v30, %v922_v57  ;;  %v937_v2 = vsel %vm936_vm7, %v920_v42, %v924_v49  ;;  %vm833_vm8 = vcmp.lt.s32.totalorder %v830_v10, %v832_v26 }
 0x182   : > { %v930_v11 = vsel %vm914_vm4, %v1754_v28, 64  ;;  %vm938_vm9 = vcmp.lt.s32.totalorder %v935_v58, %v926_v0  ;;  %vm940_vm10 = vcmp.lt.s32.totalorder %v937_v2, %v928_v50  ;;  %v834_v12 = vsel %vm833_vm8, %v830_v10, %v832_v26 }
 0x183   : > { %v932_v5 = vsel %vm916_vm5, %v1757_v29, 64  ;;  %v939_v6 = vsel %vm938_vm9, %v935_v58, %v926_v0  ;;  %v941_v48 = vsel %vm940_vm10, %v937_v2, %v928_v50  ;;  %v835_v13 = vrot.slane %v834_v12, 4 }
 0x184   : > { %vm942_vm11 = vcmp.lt.s32.totalorder %v939_v6, %v930_v11  ;;  %vm944_vm12 = vcmp.lt.s32.totalorder %v941_v48, %v932_v5 }
 0x185   : > { %v943_v36 = vsel %vm942_vm11, %v939_v6, %v930_v11  ;;  %v945_v18 = vsel %vm944_vm12, %v941_v48, %v932_v5  ;;  %vm836_vm13 = vcmp.lt.s32.totalorder %v834_v12, %v835_v13 }
 0x186   : > { %vm946_vm14 = vcmp.lt.s32.totalorder %v943_v36, %v945_v18  ;;  %v837_v15 = vsel %vm836_vm13, %v834_v12, %v835_v13 }
 0x187   : > { %v947_v37 = vsel %vm946_vm14, %v943_v36, %v945_v18  ;;  %v838_v7 = vrot.slane %v837_v15, 2 }
 0x188   : > { %v948_v55 = vrot.slane %v947_v37, 4 }
 0x189   : > { %vm839_vm15 = vcmp.lt.s32.totalorder %v837_v15, %v838_v7 }
 0x18a   : > { %vm949_vm0 = vcmp.lt.s32.totalorder %v947_v37, %v948_v55  ;;  %v840_v19 = vsel %vm839_vm15, %v837_v15, %v838_v7 }
 0x18b   : > { %v950_v56 = vsel %vm949_vm0, %v947_v37, %v948_v55  ;;  %v841_v60 = vrot.slane %v840_v19, 1 }
 0x18c   : > { %v951_v20 = vrot.slane %v950_v56, 2 }
 0x18d   : > { %vm842_vm1 = vcmp.lt.s32.totalorder %v840_v19, %v841_v60 }
 0x18e   : > { %vm952_vm2 = vcmp.lt.s32.totalorder %v950_v56, %v951_v20  ;;  %v843_v32 = vsel %vm842_vm1, %v840_v19, %v841_v60 }
 0x18f   : > { %v953_v54 = vsel %vm952_vm2, %v950_v56, %v951_v20  ;;  %vm845_vm3 = vcmp.eq.s32.totalorder %v1736_v17, %v843_v32  ;;  %vm847_vm4 = vcmp.eq.s32.totalorder %v1739_v22, %v843_v32  ;;  %vm849_vm5 = vcmp.eq.s32.totalorder %v1742_v23, %v843_v32 }
 0x190   : > { %v954_v31 = vrot.slane %v953_v54, 1  ;;  %vm851_vm6 = vcmp.eq.s32.totalorder %v1745_v24, %v843_v32  ;;  %vm853_vm7 = vcmp.eq.s32.totalorder %v1748_v25, %v843_v32  ;;  %vm855_vm8 = vcmp.eq.s32.totalorder %v1751_v27, %v843_v32 }
 0x191   : > { %vm857_vm10 = vcmp.eq.s32.totalorder %v1754_v28, %v843_v32  ;;  %vm859_vm11 = vcmp.eq.s32.totalorder %v1757_v29, %v843_v32  ;;  %v2137_v45 = vsel %vm845_vm3, -inf, %v1994_v14  ;;  %v2140_v51 = vsel %vm847_vm4, -inf, %v2000_v34 }
 0x192   : > { %vm955_vm9 = vcmp.lt.s32.totalorder %v953_v54, %v954_v31  ;;  %v2143_v53 = vsel %vm849_vm5, -inf, %v2006_v44  ;;  %v2146_v62 = vsel %vm851_vm6, -inf, %v2009_v40  ;;  %v2205_v42 = vsel %vm857_vm10, -inf, %v2032_v21 }
 0x193   : > { %v956_v61 = vsel %vm955_vm9, %v953_v54, %v954_v31 }
 0x194   : > { %vm980_vm12 = vcmp.eq.s32.totalorder %v1736_v17, %v956_v61  ;;  %vm982_vm13 = vcmp.eq.s32.totalorder %v1739_v22, %v956_v61  ;;  %vm984_vm14 = vcmp.eq.s32.totalorder %v1742_v23, %v956_v61  ;;  %vm986_vm15 = vcmp.eq.s32.totalorder %v1745_v24, %v956_v61 }
 0x195   : > { %vm988_vm0 = vcmp.eq.s32.totalorder %v1748_v25, %v956_v61  ;;  %vm990_vm1 = vcmp.eq.s32.totalorder %v1751_v27, %v956_v61  ;;  %vm992_vm2 = vcmp.eq.s32.totalorder %v1754_v28, %v956_v61  ;;  %vm994_vm3 = vcmp.eq.s32.totalorder %v1757_v29, %v956_v61 }
 0x196   : > { %v2157_v14 = vsel %vm980_vm12, -inf, %v2059_v33  ;;  %v2160_v34 = vsel %vm982_vm13, -inf, %v2062_v43  ;;  %v2163_v44 = vsel %vm984_vm14, -inf, %v2065_v52  ;;  %v2166_v40 = vsel %vm986_vm15, -inf, %v2068_v46 }
 0x197   : > { %v2169_v63 = vsel %vm988_vm0, -inf, %v2071_v59  ;;  %v2172_v3 = vsel %vm990_vm1, -inf, %v2074_v35  ;;  %v2175_v16 = vsel %vm992_vm2, -inf, %v2077_v9  ;;  %v2178_v33 = vsel %vm994_vm3, -inf, %v2080_v47 }
 0x198   : > { %v1012_v43 = vmax.f32 %v2157_v14, %v2163_v44  ;;  %v1013_v52 = vmax.f32 %v2160_v34, %v2166_v40  ;;  %v889_v46 = vmax.f32 %v2137_v45, %v2143_v53  ;;  %v890_v59 = vmax.f32 %v2140_v51, %v2146_v62 }
 0x199   : > { %v2191_v35 = vsel %vm853_vm7, -inf, %v2023_v41  ;;  %v2196_v9 = vsel %vm855_vm8, -inf, %v2028_v39  ;;  %v2210_v41 = vsel %vm859_vm11, -inf, %v2036_v38 }
 0x19a   : > { %v1014_v47 = vmax.f32 %v1012_v43, %v2169_v63  ;;  %v1015_v8 = vmax.f32 %v1013_v52, %v2172_v3  ;;  %v891_v4 = vmax.f32 %v889_v46, %v2191_v35  ;;  %v892_v30 = vmax.f32 %v890_v59, %v2196_v9 }
 0x19c   : > { %v1016_v39 = vmax.f32 %v1014_v47, %v2175_v16  ;;  %v1017_v57 = vmax.f32 %v1015_v8, %v2178_v33  ;;  %v893_v49 = vmax.f32 %v891_v4, %v2205_v42  ;;  %v894_v0 = vmax.f32 %v892_v30, %v2210_v41 }
 0x19e   : > { %v1018_v10 = vmax.f32 %v1016_v39, %v1017_v57  ;;  %v895_v26 = vmax.f32 %v893_v49, %v894_v0 }
 0x1a0   : > { %v1019_v50 = vrot.slane %v1018_v10, 4  ;;  %v896_v58 = vrot.slane %v895_v26, 4 }
 0x1a2   : > { %v1020_v2 = vmax.f32 %v1018_v10, %v1019_v50  ;;  %v897_v21 = vmax.f32 %v895_v26, %v896_v58 }
 0x1a4   : > { %v1021_v11 = vrot.slane %v1020_v2, 2  ;;  %v898_v12 = vrot.slane %v897_v21, 2 }
 0x1a6   : > { %v1022_v5 = vmax.f32 %v1020_v2, %v1021_v11  ;;  %v899_v6 = vmax.f32 %v897_v21, %v898_v12 }
 0x1a8   : > { %v1023_v38 = vrot.slane %v1022_v5, 1  ;;  %v900_v48 = vrot.slane %v899_v6, 1 }
 0x1aa   : > { %v1024_v13 = vmax.f32 %v1022_v5, %v1023_v38  ;;  %v901_v36 = vmax.f32 %v899_v6, %v900_v48 }
 0x1ac   : > { %vm1038_vm4 = vcmp.eq.f32.partialorder %v2157_v14, %v1024_v13  ;;  %vm1040_vm5 = vcmp.eq.f32.partialorder %v2160_v34, %v1024_v13  ;;  %vm1042_vm6 = vcmp.eq.f32.partialorder %v2163_v44, %v1024_v13  ;;  %vm1044_vm7 = vcmp.eq.f32.partialorder %v2166_v40, %v1024_v13 }
 0x1ad   : > { %vm1046_vm8 = vcmp.eq.f32.partialorder %v2169_v63, %v1024_v13  ;;  %vm1048_vm9 = vcmp.eq.f32.partialorder %v2172_v3, %v1024_v13  ;;  %vm1050_vm10 = vcmp.eq.f32.partialorder %v2175_v16, %v1024_v13  ;;  %vm1052_vm11 = vcmp.eq.f32.partialorder %v2178_v33, %v1024_v13 }
 0x1ae   : > { %v1054_v18 = vsel %vm1038_vm4, %v1736_v17, 64  ;;  %v1056_v15 = vsel %vm1040_vm5, %v1739_v22, 64  ;;  %v1058_v37 = vsel %vm1042_vm6, %v1742_v23, 64  ;;  %v1060_v7 = vsel %vm1044_vm7, %v1745_v24, 64 }
 0x1af   : > { %v1062_v55 = vsel %vm1046_vm8, %v1748_v25, 64  ;;  %v1064_v19 = vsel %vm1048_vm9, %v1751_v27, 64  ;;  %v1066_v56 = vsel %vm1050_vm10, %v1754_v28, 64  ;;  %v1068_v60 = vsel %vm1052_vm11, %v1757_v29, 64 }
 0x1b0   : > { %vm1070_vm12 = vcmp.lt.s32.totalorder %v1054_v18, %v1058_v37  ;;  %vm1072_vm13 = vcmp.lt.s32.totalorder %v1056_v15, %v1060_v7  ;;  %vm903_vm14 = vcmp.eq.f32.partialorder %v2137_v45, %v901_v36  ;;  %vm905_vm15 = vcmp.eq.f32.partialorder %v2140_v51, %v901_v36 }
 0x1b1   : > { %v1071_v20 = vsel %vm1070_vm12, %v1054_v18, %v1058_v37  ;;  %v1073_v32 = vsel %vm1072_vm13, %v1056_v15, %v1060_v7  ;;  %vm907_vm2 = vcmp.eq.f32.partialorder %v2143_v53, %v901_v36  ;;  %vm909_vm3 = vcmp.eq.f32.partialorder %v2146_v62, %v901_v36 }
 0x1b2   : > { %vm1074_vm0 = vcmp.lt.s32.totalorder %v1071_v20, %v1062_v55  ;;  %vm1076_vm1 = vcmp.lt.s32.totalorder %v1073_v32, %v1064_v19  ;;  %vm911_vm4 = vcmp.eq.f32.partialorder %v2191_v35, %v901_v36  ;;  %vm913_vm5 = vcmp.eq.f32.partialorder %v2196_v9, %v901_v36 }
 0x1b3   : > { %v1075_v54 = vsel %vm1074_vm0, %v1071_v20, %v1062_v55  ;;  %v1077_v31 = vsel %vm1076_vm1, %v1073_v32, %v1064_v19  ;;  %v919_v61 = vsel %vm903_vm14, %v1736_v17, 64  ;;  %v921_v43 = vsel %vm905_vm15, %v1739_v22, 64 }
 0x1b4   : > { %vm1078_vm6 = vcmp.lt.s32.totalorder %v1075_v54, %v1066_v56  ;;  %vm1080_vm7 = vcmp.lt.s32.totalorder %v1077_v31, %v1068_v60  ;;  %v923_v59 = vsel %vm907_vm2, %v1742_v23, 64  ;;  %v925_v47 = vsel %vm909_vm3, %v1745_v24, 64 }
 0x1b5   : > { %v1079_v52 = vsel %vm1078_vm6, %v1075_v54, %v1066_v56  ;;  %v1081_v46 = vsel %vm1080_vm7, %v1077_v31, %v1068_v60  ;;  %vm915_vm9 = vcmp.eq.f32.partialorder %v2205_v42, %v901_v36  ;;  %vm917_vm10 = vcmp.eq.f32.partialorder %v2210_v41, %v901_v36 }
 0x1b6   : > { %vm1082_vm8 = vcmp.lt.s32.totalorder %v1079_v52, %v1081_v46  ;;  %v927_v4 = vsel %vm911_vm4, %v1748_v25, 64  ;;  %vm957_vm11 = vcmp.lt.s32.totalorder %v919_v61, %v923_v59  ;;  %vm959_vm12 = vcmp.lt.s32.totalorder %v921_v43, %v925_v47 }
 0x1b7   : > { %v1083_v8 = vsel %vm1082_vm8, %v1079_v52, %v1081_v46  ;;  %v929_v39 = vsel %vm913_vm5, %v1751_v27, 64  ;;  %v958_v57 = vsel %vm957_vm11, %v919_v61, %v923_v59  ;;  %v960_v49 = vsel %vm959_vm12, %v921_v43, %v925_v47 }
 0x1b8   : > { %v1084_v30 = vrot.slane %v1083_v8, 4  ;;  %v931_v0 = vsel %vm915_vm9, %v1754_v28, 64  ;;  %vm961_vm13 = vcmp.lt.s32.totalorder %v958_v57, %v927_v4  ;;  %vm963_vm14 = vcmp.lt.s32.totalorder %v960_v49, %v929_v39 }
 0x1b9   : > { %v933_v10 = vsel %vm917_vm10, %v1757_v29, 64  ;;  %v962_v26 = vsel %vm961_vm13, %v958_v57, %v927_v4  ;;  %v964_v50 = vsel %vm963_vm14, %v960_v49, %v929_v39 }
 0x1ba   : > { %vm1085_vm15 = vcmp.lt.s32.totalorder %v1083_v8, %v1084_v30  ;;  %vm965_vm0 = vcmp.lt.s32.totalorder %v962_v26, %v931_v0  ;;  %vm967_vm1 = vcmp.lt.s32.totalorder %v964_v50, %v933_v10 }
 0x1bb   : > { %v1086_v58 = vsel %vm1085_vm15, %v1083_v8, %v1084_v30  ;;  %v966_v21 = vsel %vm965_vm0, %v962_v26, %v931_v0  ;;  %v968_v11 = vsel %vm967_vm1, %v964_v50, %v933_v10 }
 0x1bc   : > { %v1087_v2 = vrot.slane %v1086_v58, 2  ;;  %vm969_vm2 = vcmp.lt.s32.totalorder %v966_v21, %v968_v11 }
 0x1bd   : > { %v970_v12 = vsel %vm969_vm2, %v966_v21, %v968_v11 }
 0x1be   : > { %vm1088_vm3 = vcmp.lt.s32.totalorder %v1086_v58, %v1087_v2  ;;  %v971_v6 = vrot.slane %v970_v12, 4 }
 0x1bf   : > { %v1089_v5 = vsel %vm1088_vm3, %v1086_v58, %v1087_v2 }
 0x1c0   : > { %v1090_v38 = vrot.slane %v1089_v5, 1  ;;  %vm972_vm4 = vcmp.lt.s32.totalorder %v970_v12, %v971_v6 }
 0x1c1   : > { %v973_v48 = vsel %vm972_vm4, %v970_v12, %v971_v6 }
 0x1c2   : > { %vm1091_vm5 = vcmp.lt.s32.totalorder %v1089_v5, %v1090_v38  ;;  %v974_v36 = vrot.slane %v973_v48, 2 }
 0x1c3   : > { %v1092_v13 = vsel %vm1091_vm5, %v1089_v5, %v1090_v38 }
 0x1c4   : > { %vm1118_vm6 = vcmp.eq.s32.totalorder %v1739_v22, %v1092_v13  ;;  %vm1122_vm7 = vcmp.eq.s32.totalorder %v1745_v24, %v1092_v13  ;;  %vm1124_vm8 = vcmp.eq.s32.totalorder %v1748_v25, %v1092_v13  ;;  %vm1126_vm9 = vcmp.eq.s32.totalorder %v1751_v27, %v1092_v13 }
 0x1c5   : > { %vm1128_vm10 = vcmp.eq.s32.totalorder %v1754_v28, %v1092_v13  ;;  %vm1130_vm11 = vcmp.eq.s32.totalorder %v1757_v29, %v1092_v13  ;;  %v1134_v18 = vsel %vm1118_vm6, -inf, %v2160_v34  ;;  %v1138_v15 = vsel %vm1122_vm7, -inf, %v2166_v40 }
 0x1c6   : > { %v1140_v37 = vsel %vm1124_vm8, -inf, %v2169_v63  ;;  %v1142_v7 = vsel %vm1126_vm9, -inf, %v2172_v3  ;;  %v1144_v55 = vsel %vm1128_vm10, -inf, %v2175_v16  ;;  %v1146_v19 = vsel %vm1130_vm11, -inf, %v2178_v33 }
 0x1c7   : > { %vm1156_vm12 = vcmp.eq.f32.partialorder %v1140_v37, -inf  ;;  %vm1158_vm13 = vcmp.eq.f32.partialorder %v1142_v7, -inf  ;;  %vm1160_vm14 = vcmp.eq.f32.partialorder %v1144_v55, -inf  ;;  %vm1162_vm15 = vcmp.eq.f32.partialorder %v1146_v19, -inf }
 0x1c8   : > { %vm1170_vm0 = vmpackc.low %vm1158_vm13, %vm1156_vm12  ;;  %vm975_vm1 = vcmp.lt.s32.totalorder %v973_v48, %v974_v36  ;;  %vm1116_vm2 = vcmp.eq.s32.totalorder %v1736_v17, %v1092_v13  ;;  %vm1120_vm3 = vcmp.eq.s32.totalorder %v1742_v23, %v1092_v13  ;;  %vm1150_vm4 = vcmp.eq.f32.partialorder %v1134_v18, -inf }
 0x1c9   : > { %vm1171_vm5 = vmpackc.low %vm1162_vm15, %vm1160_vm14  ;;  %v976_v34 = vsel %vm975_vm1, %v973_v48, %v974_v36  ;;  %v1132_v40 = vsel %vm1116_vm2, -inf, %v2157_v14  ;;  %v1136_v63 = vsel %vm1120_vm3, -inf, %v2163_v44  ;;  %vm1154_vm6 = vcmp.eq.f32.partialorder %v1138_v15, -inf }
 0x1ca   : > { %vm1172_vm7 = vmpackc.even %vm1171_vm5, %vm1170_vm0  ;;  %v977_v3 = vrot.slane %v976_v34, 1  ;;  %vm1148_vm8 = vcmp.eq.f32.partialorder %v1132_v40, -inf  ;;  %vm1152_vm9 = vcmp.eq.f32.partialorder %v1136_v63, -inf }
 0x1cb   : > { %v1178_v16 = vsel %vm1172_vm7, 16843009, %v1538_v1  ;;  %vm2270_vm10 = vmpackc.low %vm1150_vm4, %vm1148_vm8 }
 0x1cc   : > { %1182 = vst [vmem:[%s2274_s21 + $0x10] sm:$0xff] %v1178_v16  ;;  %vm978_vm11 = vcmp.lt.s32.totalorder %v976_v34, %v977_v3  ;;  %vm2277_vm12 = vmpackc.low %vm1154_vm6, %vm1152_vm9 }
 0x1cd   : > { %v979_v44 = vsel %vm978_vm11, %v976_v34, %v977_v3  ;;  %vm1166_vm13 = vmpackc.even %vm2277_vm12, %vm2270_vm10 }
 0x1ce   : > { %vm981_vm14 = vcmp.eq.s32.totalorder %v1736_v17, %v979_v44  ;;  %vm983_vm15 = vcmp.eq.s32.totalorder %v1739_v22, %v979_v44  ;;  %vm985_vm0 = vcmp.eq.s32.totalorder %v1742_v23, %v979_v44  ;;  %vm987_vm1 = vcmp.eq.s32.totalorder %v1745_v24, %v979_v44 }
 0x1cf   : > { %vm989_vm2 = vcmp.eq.s32.totalorder %v1748_v25, %v979_v44  ;;  %vm991_vm3 = vcmp.eq.s32.totalorder %v1751_v27, %v979_v44  ;;  %v2292_v56 = vsel %vm981_vm14, -inf, %v2137_v45  ;;  %v2295_v60 = vsel %vm983_vm15, -inf, %v2140_v51 }
 0x1d0   : > { %v2298_v20 = vsel %vm985_vm0, -inf, %v2143_v53  ;;  %v2301_v32 = vsel %vm987_vm1, -inf, %v2146_v62  ;;  %vm993_vm4 = vcmp.eq.s32.totalorder %v1754_v28, %v979_v44  ;;  %vm995_vm5 = vcmp.eq.s32.totalorder %v1757_v29, %v979_v44 }
 0x1d1   : > { %v1025_v54 = vmax.f32 %v2292_v56, %v2298_v20  ;;  %v1026_v45 = vmax.f32 %v2295_v60, %v2301_v32  ;;  %v1176_v31 = vsel %vm1166_vm13, 16843009, %v1538_v1  ;;  %v2311_v51 = vsel %vm989_vm2, -inf, %v2191_v35 }
 0x1d2   : > { %v2314_v53 = vsel %vm991_vm3, -inf, %v2196_v9  ;;  %1180 = vst [vmem:[%s2274_s21] sm:$0xff] %v1176_v31  ;;  %v1009_v43 = vsel %vm993_vm4, -inf, %v2205_v42  ;;  %v1011_v52 = vsel %vm995_vm5, -inf, %v2210_v41 }
 0x1d3   : > { %v1027_v62 = vmax.f32 %v1025_v54, %v2311_v51  ;;  %v1028_v61 = vmax.f32 %v1026_v45, %v2314_v53 }
 0x1d5   : > { %v1029_v46 = vmax.f32 %v1027_v62, %v1009_v43  ;;  %v1030_v59 = vmax.f32 %v1028_v61, %v1011_v52 }
 0x1d7   : > { %v1031_v47 = vmax.f32 %v1029_v46, %v1030_v59 }
 0x1d9   : > { %v1032_v8 = vrot.slane %v1031_v47, 4 }
 0x1db   : > { %v1033_v4 = vmax.f32 %v1031_v47, %v1032_v8 }
 0x1dd   : > { %v1034_v30 = vrot.slane %v1033_v4, 2 }
 0x1df   : > { %v1035_v35 = vmax.f32 %v1033_v4, %v1034_v30 }
 0x1e1   : > { %v1036_v39 = vrot.slane %v1035_v35, 1 }
 0x1e3   : > { %v1037_v57 = vmax.f32 %v1035_v35, %v1036_v39 }
 0x1e5   : > { %vm1039_vm6 = vcmp.eq.f32.partialorder %v2292_v56, %v1037_v57  ;;  %vm1041_vm7 = vcmp.eq.f32.partialorder %v2295_v60, %v1037_v57  ;;  %vm1043_vm8 = vcmp.eq.f32.partialorder %v2298_v20, %v1037_v57  ;;  %vm1045_vm9 = vcmp.eq.f32.partialorder %v2301_v32, %v1037_v57 }
 0x1e6   : > { %vm1047_vm10 = vcmp.eq.f32.partialorder %v2311_v51, %v1037_v57  ;;  %vm1049_vm11 = vcmp.eq.f32.partialorder %v2314_v53, %v1037_v57  ;;  %v1055_v9 = vsel %vm1039_vm6, %v1736_v17, 64  ;;  %v1057_v42 = vsel %vm1041_vm7, %v1739_v22, 64 }
 0x1e7   : > { %v1059_v41 = vsel %vm1043_vm8, %v1742_v23, 64  ;;  %v1061_v49 = vsel %vm1045_vm9, %v1745_v24, 64  ;;  %vm1051_vm12 = vcmp.eq.f32.partialorder %v1009_v43, %v1037_v57  ;;  %vm1053_vm13 = vcmp.eq.f32.partialorder %v1011_v52, %v1037_v57 }
 0x1e8   : > { %vm1093_vm14 = vcmp.lt.s32.totalorder %v1055_v9, %v1059_v41  ;;  %vm1095_vm15 = vcmp.lt.s32.totalorder %v1057_v42, %v1061_v49  ;;  %v1063_v0 = vsel %vm1047_vm10, %v1748_v25, 64  ;;  %v1065_v10 = vsel %vm1049_vm11, %v1751_v27, 64 }
 0x1e9   : > { %v1094_v26 = vsel %vm1093_vm14, %v1055_v9, %v1059_v41  ;;  %v1096_v50 = vsel %vm1095_vm15, %v1057_v42, %v1061_v49  ;;  %v1067_v58 = vsel %vm1051_vm12, %v1754_v28, 64  ;;  %v1069_v2 = vsel %vm1053_vm13, %v1757_v29, 64 }
 0x1ea   : > { %vm1097_vm0 = vcmp.lt.s32.totalorder %v1094_v26, %v1063_v0  ;;  %vm1099_vm1 = vcmp.lt.s32.totalorder %v1096_v50, %v1065_v10 }
 0x1eb   : > { %v1098_v21 = vsel %vm1097_vm0, %v1094_v26, %v1063_v0  ;;  %v1100_v11 = vsel %vm1099_vm1, %v1096_v50, %v1065_v10 }
 0x1ec   : > { %vm1101_vm2 = vcmp.lt.s32.totalorder %v1098_v21, %v1067_v58  ;;  %vm1103_vm3 = vcmp.lt.s32.totalorder %v1100_v11, %v1069_v2 }
 0x1ed   : > { %v1102_v12 = vsel %vm1101_vm2, %v1098_v21, %v1067_v58  ;;  %v1104_v5 = vsel %vm1103_vm3, %v1100_v11, %v1069_v2 }
 0x1ee   : > { %vm1105_vm4 = vcmp.lt.s32.totalorder %v1102_v12, %v1104_v5 }
 0x1ef   : > { %v1106_v6 = vsel %vm1105_vm4, %v1102_v12, %v1104_v5 }
 0x1f0   : > { %v1107_v38 = vrot.slane %v1106_v6, 4 }
 0x1f2   : > { %vm1108_vm5 = vcmp.lt.s32.totalorder %v1106_v6, %v1107_v38 }
 0x1f3   : > { %v1109_v48 = vsel %vm1108_vm5, %v1106_v6, %v1107_v38 }
 0x1f4   : > { %v1110_v13 = vrot.slane %v1109_v48, 2 }
 0x1f6   : > { %vm1111_vm6 = vcmp.lt.s32.totalorder %v1109_v48, %v1110_v13 }
 0x1f7   : > { %v1112_v36 = vsel %vm1111_vm6, %v1109_v48, %v1110_v13 }
 0x1f8   : > { %v1113_v18 = vrot.slane %v1112_v36, 1 }
 0x1fa   : > { %vm1114_vm7 = vcmp.lt.s32.totalorder %v1112_v36, %v1113_v18 }
 0x1fb   : > { %v1115_v15 = vsel %vm1114_vm7, %v1112_v36, %v1113_v18 }
 0x1fc   : > { %vm1119_vm8 = vcmp.eq.s32.totalorder %v1739_v22, %v1115_v15  ;;  %vm1123_vm9 = vcmp.eq.s32.totalorder %v1745_v24, %v1115_v15  ;;  %vm1125_vm10 = vcmp.eq.s32.totalorder %v1748_v25, %v1115_v15  ;;  %vm1127_vm11 = vcmp.eq.s32.totalorder %v1751_v27, %v1115_v15 }
 0x1fd   : > { %vm1129_vm12 = vcmp.eq.s32.totalorder %v1754_v28, %v1115_v15  ;;  %vm1131_vm13 = vcmp.eq.s32.totalorder %v1757_v29, %v1115_v15  ;;  %v1135_v37 = vsel %vm1119_vm8, -inf, %v2295_v60  ;;  %v1139_v7 = vsel %vm1123_vm9, -inf, %v2301_v32 }
 0x1fe   : > { %v1141_v55 = vsel %vm1125_vm10, -inf, %v2311_v51  ;;  %v1143_v19 = vsel %vm1127_vm11, -inf, %v2314_v53  ;;  %v1145_v22 = vsel %vm1129_vm12, -inf, %v1009_v43  ;;  %v1147_v24 = vsel %vm1131_vm13, -inf, %v1011_v52 }
 0x1ff   : > { %vm1157_vm14 = vcmp.eq.f32.partialorder %v1141_v55, -inf  ;;  %vm1159_vm15 = vcmp.eq.f32.partialorder %v1143_v19, -inf  ;;  %vm1161_vm0 = vcmp.eq.f32.partialorder %v1145_v22, -inf  ;;  %vm1163_vm1 = vcmp.eq.f32.partialorder %v1147_v24, -inf }
 0x200   : > { %vm1173_vm2 = vmpackc.low %vm1159_vm15, %vm1157_vm14  ;;  %vm1117_vm3 = vcmp.eq.s32.totalorder %v1736_v17, %v1115_v15  ;;  %vm1121_vm4 = vcmp.eq.s32.totalorder %v1742_v23, %v1115_v15  ;;  %vm1151_vm5 = vcmp.eq.f32.partialorder %v1135_v37, -inf  ;;  %vm1155_vm7 = vcmp.eq.f32.partialorder %v1139_v7, -inf }
 0x201   : > { %vm1174_vm6 = vmpackc.low %vm1163_vm1, %vm1161_vm0  ;;  %v1133_v25 = vsel %vm1117_vm3, -inf, %v2292_v56  ;;  %v1137_v27 = vsel %vm1121_vm4, -inf, %v2298_v20 }
 0x202   : > { %vm1175_vm8 = vmpackc.even %vm1174_vm6, %vm1173_vm2  ;;  %vm1149_vm9 = vcmp.eq.f32.partialorder %v1133_v25, -inf  ;;  %vm1153_vm10 = vcmp.eq.f32.partialorder %v1137_v27, -inf }
 0x203   : > { %v1179_v28 = vsel %vm1175_vm8, 16843009, %v1538_v1  ;;  %vm1167_vm11 = vmpackc.low %vm1151_vm5, %vm1149_vm9 }
 0x204   : > { %1183 = vst [vmem:[%s2274_s21 + $0x18] sm:$0xff] %v1179_v28  ;;  %vm1168_vm12 = vmpackc.low %vm1155_vm7, %vm1153_vm10 }
 0x205   : > { %vm1169_vm13 = vmpackc.even %vm1168_vm12, %vm1167_vm11 }
 0x206   : > { %v1177_v17 = vsel %vm1169_vm13, 16843009, %v1538_v1 }
 0x207   : > { %1181 = vst [vmem:[%s2274_s21 + $0x8] sm:$0xff] %v1177_v17 }
 0x208   : > { %1470 = shalt.err (!%p1467_p5)
}
 0x209   : > { %s1471_s10 = scalar_lea.hbm %s2356_s5, 512  ;;  %s1475_s13 = scalar_lea.hbm %s2413_s3, 1024 }
 0x20a   : > { %p1472_p6 = scmp.ne.s32.totalorder %s2356_s5, %s1471_s10  ;;  %p1476_p10 = scmp.lt.u32.totalorder %s2356_s5, %s2413_s3 }
 0x20b   : > { %p1477_p11 = scmp.lt.u32.totalorder %s1475_s13, %s1471_s10  ;;  %p1479_p13 = scmp.lt.u32.totalorder %s1471_s10, %s2356_s5 }
 0x20c   : > { %p1473_p7 = pnand %p1472_p6, %p1607_p4 }
 0x20d   : > { %p1478_p12 = por %p1477_p11, %p1476_p10 }
 0x20e   : > { %p1474_p9 = pneg %p1473_p7 }
 0x20f   : > { %p1480_p0 = por %p1479_p13, %p1478_p12 }
 0x211   : > { %p1481_p1 = pnand %p1480_p0, %p1474_p9 }
 0x213   : > { %1484 = shalt.err (!%p1481_p1)
}
 0x214   : > { %s1540_s21 = smov 256   ;;  %s1541_s22 = smov 16  }
 0x215   : > { %1359 = dma.vmem_to_hbm [thread:$0]  (%p1607_p4), %s2358_s24, 512, %s2356_s5, %s2364_s18, %s1540_s21, %s1540_s21, %s1541_s22  }
 0x216 PF: > { %p1365_p2 = scmp.ge.s32.totalorder %s1535_s20, 2  ;;  %s1228_s26 = sand.u32 1, %s1515_s15  }
 0x217   : > { %s1229_s30 = scalar_lea.sflag [#allocation4], %s1228_s26 }
 0x218   : > { %p1362_p3 = pnand %p1365_p2, %p1614_p8 }
 0x21a   : > { %1510 = dma.done.wait (!%p1362_p3), %s1229_s30, 512  }
 0x21b   : > { %1512 = vsyncadd (!%p1362_p3), %s1229_s30, 4294966784  ;;  %s18_s20 = sadd.s32 1, %s1535_s20   ;;  %s2421_s15 = smov %s1519_s16 }
 0x21c   : > { %p15_p5 = scmp.ge.s32.totalorder %s18_s20, 4   ;;  %s2422_s16 = smov %s1523_s17 }
 0x21d   : > { %s2423_s17 = smov %s1620_s28  ;;  %s2424_s18 = smov %s1531_s19 }
 0x21e   : > { %s2425_s19 = smov %s2427_s23  ;;  %17 = sbr.rel (!%p15_p5) target bundleno = 4 (0x4), region = 79 }
 0x225   :  { %1246 = vsyncpa [#allocation4], 1 }
 0x226   :  { %1248 = vsyncpa [#allocation4 + $0x1], 1 }

</bundles_post_ra>
